<compile_context>
chip_gen: v6e
topology: v6e:2x2x1
jax: 0.10.0
libtpu: 0.0.40
codegen_flags: <defaults>
</compile_context>

<pallas_src>
import functools

import numpy as np
import jax
import jax.numpy as jnp
from jax.experimental import pallas as pl
from jax.experimental.pallas import tpu as pltpu

NEG_SLOPE = 0.01  # torch.nn.LeakyReLU default


def _leaky_relu(h):
    return jnp.where(h > 0, h, NEG_SLOPE * h)


def _mxu_is_256_wide():
    """True on v6e / v7x (256x256 MXU); False on v5e and older (128x128 MXUs)."""
    try:
        kind = jax.devices()[0].device_kind.lower()
    except Exception:
        return True
    return not any(tag in kind for tag in ("v2", "v3", "v4", "v5"))


def _realnvp_kernel(
    x_in_ref,            # (n_in,  TB) bf16 : mask==1 (conditioning) features
    x_out_ref,           # (n_out, TB) f32  : mask==0 (transformed) features
    w1_ref, b1_ref,      # (2H, n_in) bf16 , (2H, 1) f32  -- fused scale|translate layer 1
    w2_ref, b2_ref,      # fused: (2H, 2H) bf16 block-diag ; else (2H, H) bf16 [w2s; w2t]
    w3_ref, b3_ref,      # fused: (2*n_out, 2H) bf16       ; else (2*n_out, H) bf16
    z_ref,               # (n_out, TB) f32  : coupled half only
    ld_ref,              # (1,     TB) f32
    *, hidden, n_out, fused,
):
    H = hidden

    # Layer 1 (both MLPs fused): (2H, n_in) x (n_in, TB), straight from the bf16 ref.
    h1 = jnp.dot(w1_ref[...], x_in_ref[...], preferred_element_type=jnp.float32)
    h1 = _leaky_relu(h1 + b1_ref[...])                       # (2H, TB) f32
    h1_bf = h1.astype(jnp.bfloat16)

    if fused:
        # 256-wide MXU path (v6e/v7x): block-diagonal layer 2 + layer 3.
        h2 = _leaky_relu(
            jnp.dot(w2_ref[...], h1_bf, preferred_element_type=jnp.float32) + b2_ref[...]
        ).astype(jnp.bfloat16)                                # (2H, TB)
        st = jnp.dot(w3_ref[...], h2, preferred_element_type=jnp.float32) + b3_ref[...]
    else:
        # 128-wide MXU path (v5e): two separate matmuls per layer, interleave on the
        # two vector-extended slots.
        w2 = w2_ref[...]
        b2 = b2_ref[...]
        h2_s = _leaky_relu(
            jnp.dot(w2[:H], h1_bf[:H], preferred_element_type=jnp.float32) + b2[:H]
        ).astype(jnp.bfloat16)
        h2_t = _leaky_relu(
            jnp.dot(w2[H:], h1_bf[H:], preferred_element_type=jnp.float32) + b2[H:]
        ).astype(jnp.bfloat16)
        w3 = w3_ref[...]
        s_part = jnp.dot(w3[:n_out], h2_s, preferred_element_type=jnp.float32)
        t_part = jnp.dot(w3[n_out:], h2_t, preferred_element_type=jnp.float32)
        st = jnp.concatenate([s_part, t_part], axis=0) + b3_ref[...]

    s = st[:n_out, :]                                         # (n_out, TB) f32
    t = st[n_out:, :]

    # Only the coupled half of z is computed/stored; identity half comes from f32 x
    # in the wrapper.  x_out is f32 -> affine update matches strict f32 semantics.
    z_ref[...] = x_out_ref[...] * jnp.exp(s) + t
    ld_ref[...] = jnp.sum(s, axis=0, keepdims=True)


def realnvp_forward(x, mask, scale_params, translate_params, *,
                    block_b=1024, fuse_mxu_256=None):
    """RealNVP coupling-layer forward.

    x: (B, dim); mask: (dim,) binary; scale_params / translate_params: 3 x (W, b)
    with W pre-transposed to (in, out) (i.e. y = x @ W + b, as torch Linear computes).
    NOTE: `mask` must be a concrete (non-traced) value -- it defines the compile-time
    feature split.  Returns (z: (B, dim) f32, log_det_J: (B,) f32).
    """
    B, dim = x.shape
    H = scale_params[0][0].shape[1]
    assert H % 8 == 0, "hidden dim must be a multiple of 8"

    if fuse_mxu_256 is None:
        fuse_mxu_256 = _mxu_is_256_wide()

    # The binary mask is a (non-trainable) module parameter -> compile-time constant.
    mask_np = np.asarray(mask).reshape(-1)
    assert mask_np.shape[0] == dim
    assert np.all((mask_np == 0) | (mask_np == 1)), "RealNVP mask must be binary"
    in_idx = np.nonzero(mask_np == 1)[0]          # pass-through / conditioning features
    out_idx = np.nonzero(mask_np == 0)[0]         # transformed features
    n_in, n_out = len(in_idx), len(out_idx)
    assert n_in > 0 and n_out > 0, "degenerate mask"

    # ---- batch tiling: big tiles, but guarantee >= 2 grid steps when possible (v7x) ----
    TB = max(128, (int(block_b) // 128) * 128)
    b_ceil = ((B + 127) // 128) * 128
    TB = min(TB, b_ceil)
    if b_ceil >= 256 and b_ceil // TB < 2:
        TB = max(128, ((b_ceil // 2) // 128) * 128)
    B_pad = ((B + TB - 1) // TB) * TB

    # ---- weight prep (mask exploited at trace time) ----
    def prep(params):
        (w1, b1), (w2, b2), (w3, b3) = params
        w1 = jnp.asarray(w1, jnp.float32)[in_idx, :].T                 # (H, n_in)
        b1 = jnp.asarray(b1, jnp.float32).reshape(H, 1)
        w2 = jnp.asarray(w2, jnp.float32).T                            # (H, H)
        b2 = jnp.asarray(b2, jnp.float32).reshape(H, 1)
        w3 = jnp.asarray(w3, jnp.float32)[:, out_idx].T                # (n_out, H)
        b3 = jnp.asarray(b3, jnp.float32)[out_idx].reshape(n_out, 1)
        return w1, b1, w2, b2, w3, b3

    sw1, sb1, sw2, sb2, sw3, sb3 = prep(scale_params)
    tw1, tb1, tw2, tb2, tw3, tb3 = prep(translate_params)

    w1_cat = jnp.concatenate([sw1, tw1], axis=0).astype(jnp.bfloat16)  # (2H, n_in)
    b1_cat = jnp.concatenate([sb1, tb1], axis=0)                       # (2H, 1) f32
    b2_cat = jnp.concatenate([sb2, tb2], axis=0)                       # (2H, 1) f32
    b3_cat = jnp.concatenate([sb3, tb3], axis=0)                       # (2n_out, 1) f32

    if fuse_mxu_256:
        w2_op = (jnp.zeros((2 * H, 2 * H), jnp.float32)
                 .at[:H, :H].set(sw2).at[H:, H:].set(tw2)).astype(jnp.bfloat16)
        w3_op = (jnp.zeros((2 * n_out, 2 * H), jnp.float32)
                 .at[:n_out, :H].set(sw3).at[n_out:, H:].set(tw3)).astype(jnp.bfloat16)
    else:
        w2_op = jnp.concatenate([sw2, tw2], axis=0).astype(jnp.bfloat16)   # (2H, H)
        w3_op = jnp.concatenate([sw3, tw3], axis=0).astype(jnp.bfloat16)   # (2n_out, H)

    # ---- input relayout: cast to bf16 BEFORE transpose; only the needed rows travel ----
    x_f32 = x.astype(jnp.float32)
    x_in_t = jnp.transpose(x_f32[:, in_idx].astype(jnp.bfloat16))      # (n_in,  B) bf16
    x_out_t = jnp.transpose(x_f32[:, out_idx])                         # (n_out, B) f32
    if B_pad != B:
        pad = ((0, 0), (0, B_pad - B))
        x_in_t = jnp.pad(x_in_t, pad)
        x_out_t = jnp.pad(x_out_t, pad)

    grid = (B_pad // TB,)
    resident = lambda shape: pl.BlockSpec(shape, lambda i: (0, 0))     # stays in VMEM
    batch_tile = lambda rows: pl.BlockSpec((rows, TB), lambda i: (0, i))

    kernel = functools.partial(_realnvp_kernel, hidden=H, n_out=n_out, fused=fuse_mxu_256)

    flops = 2 * B_pad * (2 * H * n_in + 2 * H * H + 2 * n_out * H)
    weight_bytes = sum(int(a.size) * a.dtype.itemsize for a in
                       (w1_cat, b1_cat, w2_op, b2_cat, w3_op, b3_cat))
    bytes_accessed = (int(x_in_t.size) * 2 + int(x_out_t.size) * 4
                      + n_out * B_pad * 4 + B_pad * 4 + weight_bytes)

    z_coupled, ld = pl.pallas_call(
        kernel,
        grid=grid,
        in_specs=[
            batch_tile(n_in),
            batch_tile(n_out),
            resident((2 * H, n_in)), resident((2 * H, 1)),
            resident(tuple(w2_op.shape)), resident((2 * H, 1)),
            resident(tuple(w3_op.shape)), resident((2 * n_out, 1)),
        ],
        out_specs=(batch_tile(n_out), batch_tile(1)),
        out_shape=(
            jax.ShapeDtypeStruct((n_out, B_pad), jnp.float32),
            jax.ShapeDtypeStruct((1, B_pad), jnp.float32),
        ),
        compiler_params=pltpu.CompilerParams(
            dimension_semantics=("parallel",),
        ),
        cost_estimate=pl.CostEstimate(
            flops=int(flops),
            transcendentals=int(B_pad * n_out),
            bytes_accessed=int(bytes_accessed),
        ),
    )(x_in_t, x_out_t, w1_cat, b1_cat, w2_op, b2_cat, w3_op, b3_cat)

    # Reassemble z: identity half straight from the ORIGINAL f32 x (exact), coupled half
    # from the kernel output.
    coupled = jnp.transpose(z_coupled[:, :B])                          # (B, n_out)
    mask_row = jnp.asarray(mask_np, jnp.float32).reshape(1, -1)
    z = (x_f32 * mask_row).at[:, out_idx].set(coupled)
    log_det_J = ld[0, :B]
    return z, log_det_J


def _init_mlp_params(key, in_dim, hidden_dim=128):
    """Deterministic synthetic init. Weights returned pre-transposed to (in, out)."""
    ks = jax.random.split(key, 6)
    dims = [(in_dim, hidden_dim), (hidden_dim, hidden_dim), (hidden_dim, in_dim)]
    params = []
    for i, (din, dout) in enumerate(dims):
        w = jax.random.normal(ks[2 * i], (din, dout), jnp.float32) * 0.1
        b = jax.random.normal(ks[2 * i + 1], (dout,), jnp.float32) * 0.05
        params.append((w, b))
    return params


def _reference_forward(x, mask, scale_params, translate_params):
    """Pure-f32 JAX reference matching the PyTorch module semantics."""
    def mlp(h, params):
        (w1, b1), (w2, b2), (w3, b3) = params
        h = jax.nn.leaky_relu(jnp.dot(h, w1, precision="highest") + b1, NEG_SLOPE)
        h = jax.nn.leaky_relu(jnp.dot(h, w2, precision="highest") + b2, NEG_SLOPE)
        return jnp.dot(h, w3, precision="highest") + b3

    m = mask.reshape(1, -1)
    x_masked = x * m
    s = mlp(x_masked, scale_params) * (1 - m)
    t = mlp(x_masked, translate_params) * (1 - m)
    z = x_masked + (1 - m) * (x * jnp.exp(s) + t)
    return z, jnp.sum(s, axis=1)


def _mixed_precision_reference(x, mask, scale_params, translate_params):
    """Models the kernel's numerics exactly: bf16 operands into each matmul with f32
    accumulation; all elementwise math, the affine update, and the identity half in f32."""
    q = lambda a: a.astype(jnp.bfloat16).astype(jnp.float32)

    def mlp(h, params):
        (w1, b1), (w2, b2), (w3, b3) = params
        h = jax.nn.leaky_relu(jnp.dot(q(h), q(w1), precision="highest") + b1, NEG_SLOPE)
        h = jax.nn.leaky_relu(jnp.dot(q(h), q(w2), precision="highest") + b2, NEG_SLOPE)
        return jnp.dot(q(h), q(w3), precision="highest") + b3

    m = mask.reshape(1, -1)
    xf = x.astype(jnp.float32)
    x_masked = xf * m
    s = mlp(x_masked, scale_params) * (1 - m)
    t = mlp(x_masked, translate_params) * (1 - m)
    z = xf * m + (1 - m) * (xf * jnp.exp(s) + t)
    return z, jnp.sum(s, axis=1)


if __name__ == "__main__":
    B, dim = 512, 16            # dim from module spec (free param); hidden=128 (MLP default)
    key = jax.random.PRNGKey(0)
    kx, ks, kt = jax.random.split(key, 3)

    x = jax.random.normal(kx, (B, dim), jnp.float32)
    mask = (jnp.arange(dim) % 2).astype(jnp.float32)   # alternating binary RealNVP mask

    scale_params = _init_mlp_params(ks, dim)
    translate_params = _init_mlp_params(kt, dim)

    z, logdet = realnvp_forward(x, mask, scale_params, translate_params)
    z = jax.block_until_ready(z)
    logdet = jax.block_until_ready(logdet)
    assert z.shape == (B, dim) and logdet.shape == (B,)

    # Strict check against a reference with identical (bf16-matmul / f32-affine) numerics.
    z_mp, ld_mp = _mixed_precision_reference(x, mask, scale_params, translate_params)
    assert jnp.allclose(z, z_mp, atol=1e-3, rtol=1e-3), "z mismatch (mixed-precision ref)"
    assert jnp.allclose(logdet, ld_mp, atol=1e-3, rtol=1e-3), "log_det_J mismatch (mixed-precision ref)"

    # Sanity check against the full-f32 PyTorch-semantics reference (bf16 tolerance).
    z_f32, ld_f32 = _reference_forward(x, mask, scale_params, translate_params)
    assert jnp.allclose(z, z_f32, atol=5e-2, rtol=5e-2), "z mismatch (f32 ref)"
    assert jnp.allclose(logdet, ld_f32, atol=5e-2, rtol=5e-2), "log_det_J mismatch (f32 ref)"

    print("KERNEL_OK")
</pallas_src>

<mosaic_0001>
module attributes {stable_mosaic.version = 11 : i64} {
  func.func @_realnvp_kernel(%arg0: i32, %arg1: memref<8x256xbf16, #tpu.memory_space<vmem>>, %arg2: memref<8x256xf32, #tpu.memory_space<vmem>>, %arg3: memref<256x8xbf16, #tpu.memory_space<vmem>>, %arg4: memref<256x1xf32, #tpu.memory_space<vmem>>, %arg5: memref<256x256xbf16, #tpu.memory_space<vmem>>, %arg6: memref<256x1xf32, #tpu.memory_space<vmem>>, %arg7: memref<16x256xbf16, #tpu.memory_space<vmem>>, %arg8: memref<16x1xf32, #tpu.memory_space<vmem>>, %arg9: memref<8x256xf32, #tpu.memory_space<vmem>>, %arg10: memref<1x256xf32, #tpu.memory_space<vmem>>) attributes {dimension_semantics = [#tpu.dimension_semantics<parallel>], iteration_bounds = array<i64: 2>, scalar_prefetch = 0 : i64, scratch_operands = 0 : i64, tpu.core_type = #tpu.core_type<tc>, window_params = [{transform_indices = @transform_0, window_bounds = array<i64: 8, 256>}, {transform_indices = @transform_1, window_bounds = array<i64: 8, 256>}, {pipeline_mode = #tpu.pipeline_mode<synchronous>, transform_indices = @transform_2, window_bounds = array<i64: 256, 8>}, {pipeline_mode = #tpu.pipeline_mode<synchronous>, transform_indices = @transform_3, window_bounds = array<i64: 256, 1>}, {pipeline_mode = #tpu.pipeline_mode<synchronous>, transform_indices = @transform_4, window_bounds = array<i64: 256, 256>}, {pipeline_mode = #tpu.pipeline_mode<synchronous>, transform_indices = @transform_5, window_bounds = array<i64: 256, 1>}, {pipeline_mode = #tpu.pipeline_mode<synchronous>, transform_indices = @transform_6, window_bounds = array<i64: 16, 256>}, {pipeline_mode = #tpu.pipeline_mode<synchronous>, transform_indices = @transform_7, window_bounds = array<i64: 16, 1>}, {transform_indices = @transform_8, window_bounds = array<i64: 8, 256>}, {transform_indices = @transform_9, window_bounds = array<i64: 1, 256>}]} {
    %c0 = arith.constant 0 : index
    %c0_0 = arith.constant 0 : index
    %0 = vector.load %arg3[%c0, %c0_0] : memref<256x8xbf16, #tpu.memory_space<vmem>>, vector<256x8xbf16>
    %c0_1 = arith.constant 0 : index
    %c0_2 = arith.constant 0 : index
    %1 = vector.load %arg1[%c0_1, %c0_2] : memref<8x256xbf16, #tpu.memory_space<vmem>>, vector<8x256xbf16>
    %cst = arith.constant dense<0.000000e+00> : vector<256x256xf32>
    %2 = tpu.matmul %0, %1, %cst {dimension_numbers = #tpu.dot_dimension_numbers<[1], [0], [0], [1], [0, 0, 1, 1], [], []>} : vector<256x8xbf16>, vector<8x256xbf16>, vector<256x256xf32> -> vector<256x256xf32>
    %c0_3 = arith.constant 0 : index
    %c0_4 = arith.constant 0 : index
    %3 = vector.load %arg4[%c0_3, %c0_4] : memref<256x1xf32, #tpu.memory_space<vmem>>, vector<256x1xf32>
    %4 = vector.broadcast %3 : vector<256x1xf32> to vector<256x256xf32>
    %5 = arith.addf %2, %4 : vector<256x256xf32>
    %cst_5 = arith.constant 0.000000e+00 : f32
    %6 = vector.broadcast %cst_5 : f32 to vector<256x256xf32>
    %7 = arith.cmpf ogt, %5, %6 : vector<256x256xf32>
    %cst_6 = arith.constant 0.00999999977 : f32
    %8 = vector.broadcast %cst_6 : f32 to vector<256x256xf32>
    %9 = arith.mulf %8, %5 : vector<256x256xf32>
    %10 = arith.select %7, %5, %9 : vector<256x256xi1>, vector<256x256xf32>
    %11 = arith.truncf %10 : vector<256x256xf32> to vector<256x256xbf16>
    %c0_7 = arith.constant 0 : index
    %c0_8 = arith.constant 0 : index
    %12 = vector.load %arg5[%c0_7, %c0_8] : memref<256x256xbf16, #tpu.memory_space<vmem>>, vector<256x256xbf16>
    %cst_9 = arith.constant dense<0.000000e+00> : vector<256x256xf32>
    %13 = tpu.matmul %12, %11, %cst_9 {dimension_numbers = #tpu.dot_dimension_numbers<[1], [0], [0], [1], [0, 0, 1, 1], [], []>} : vector<256x256xbf16>, vector<256x256xbf16>, vector<256x256xf32> -> vector<256x256xf32>
    %c0_10 = arith.constant 0 : index
    %c0_11 = arith.constant 0 : index
    %14 = vector.load %arg6[%c0_10, %c0_11] : memref<256x1xf32, #tpu.memory_space<vmem>>, vector<256x1xf32>
    %15 = vector.broadcast %14 : vector<256x1xf32> to vector<256x256xf32>
    %16 = arith.addf %13, %15 : vector<256x256xf32>
    %cst_12 = arith.constant 0.000000e+00 : f32
    %17 = vector.broadcast %cst_12 : f32 to vector<256x256xf32>
    %18 = arith.cmpf ogt, %16, %17 : vector<256x256xf32>
    %cst_13 = arith.constant 0.00999999977 : f32
    %19 = vector.broadcast %cst_13 : f32 to vector<256x256xf32>
    %20 = arith.mulf %19, %16 : vector<256x256xf32>
    %21 = arith.select %18, %16, %20 : vector<256x256xi1>, vector<256x256xf32>
    %22 = arith.truncf %21 : vector<256x256xf32> to vector<256x256xbf16>
    %c0_14 = arith.constant 0 : index
    %c0_15 = arith.constant 0 : index
    %23 = vector.load %arg7[%c0_14, %c0_15] : memref<16x256xbf16, #tpu.memory_space<vmem>>, vector<16x256xbf16>
    %cst_16 = arith.constant dense<0.000000e+00> : vector<16x256xf32>
    %24 = tpu.matmul %23, %22, %cst_16 {dimension_numbers = #tpu.dot_dimension_numbers<[1], [0], [0], [1], [0, 0, 1, 1], [], []>} : vector<16x256xbf16>, vector<256x256xbf16>, vector<16x256xf32> -> vector<16x256xf32>
    %c0_17 = arith.constant 0 : index
    %c0_18 = arith.constant 0 : index
    %25 = vector.load %arg8[%c0_17, %c0_18] : memref<16x1xf32, #tpu.memory_space<vmem>>, vector<16x1xf32>
    %26 = vector.broadcast %25 : vector<16x1xf32> to vector<16x256xf32>
    %27 = arith.addf %24, %26 : vector<16x256xf32>
    %28 = vector.extract_strided_slice %27 {offsets = [0, 0], sizes = [8, 256], strides = [1, 1]} : vector<16x256xf32> to vector<8x256xf32>
    %29 = vector.extract_strided_slice %27 {offsets = [8, 0], sizes = [8, 256], strides = [1, 1]} : vector<16x256xf32> to vector<8x256xf32>
    %c0_19 = arith.constant 0 : index
    %c0_20 = arith.constant 0 : index
    %30 = vector.load %arg2[%c0_19, %c0_20] : memref<8x256xf32, #tpu.memory_space<vmem>>, vector<8x256xf32>
    %31 = math.exp %28 : vector<8x256xf32>
    %32 = arith.mulf %30, %31 : vector<8x256xf32>
    %33 = arith.addf %32, %29 : vector<8x256xf32>
    %c0_21 = arith.constant 0 : index
    %c0_22 = arith.constant 0 : index
    %34 = vector.load %arg9[%c0_21, %c0_22] : memref<8x256xf32, #tpu.memory_space<vmem>>, vector<8x256xf32>
    tpu.vector_store %arg9[%c0_21, %c0_22], %33 {strides = array<i32>} : memref<8x256xf32, #tpu.memory_space<vmem>>, vector<8x256xf32>,
    %cst_23 = arith.constant dense<0.000000e+00> : vector<256xf32>
    %35 = vector.multi_reduction <add>, %28, %cst_23 [0] : vector<8x256xf32> to vector<256xf32>
    %36 = vector.shape_cast %35 : vector<256xf32> to vector<1x256xf32>
    %c0_24 = arith.constant 0 : index
    %c0_25 = arith.constant 0 : index
    %37 = vector.load %arg10[%c0_24, %c0_25] : memref<1x256xf32, #tpu.memory_space<vmem>>, vector<1x256xf32>
    tpu.vector_store %arg10[%c0_24, %c0_25], %36 {strides = array<i32>} : memref<1x256xf32, #tpu.memory_space<vmem>>, vector<1x256xf32>,
    return
  }
  func.func @transform_0(%arg0: i32) -> (i32, i32) {
    %c0_i32 = arith.constant 0 : i32
    %c0_i32_0 = arith.constant 0 : i32
    return %c0_i32, %arg0 : i32, i32
  }
  func.func @transform_1(%arg0: i32) -> (i32, i32) {
    %c0_i32 = arith.constant 0 : i32
    %c0_i32_0 = arith.constant 0 : i32
    return %c0_i32, %arg0 : i32, i32
  }
  func.func @transform_2(%arg0: i32) -> (i32, i32) {
    %c0_i32 = arith.constant 0 : i32
    %c0_i32_0 = arith.constant 0 : i32
    %c0_i32_1 = arith.constant 0 : i32
    return %c0_i32, %c0_i32_0 : i32, i32
  }
  func.func @transform_3(%arg0: i32) -> (i32, i32) {
    %c0_i32 = arith.constant 0 : i32
    %c0_i32_0 = arith.constant 0 : i32
    %c0_i32_1 = arith.constant 0 : i32
    return %c0_i32, %c0_i32_0 : i32, i32
  }
  func.func @transform_4(%arg0: i32) -> (i32, i32) {
    %c0_i32 = arith.constant 0 : i32
    %c0_i32_0 = arith.constant 0 : i32
    %c0_i32_1 = arith.constant 0 : i32
    return %c0_i32, %c0_i32_0 : i32, i32
  }
  func.func @transform_5(%arg0: i32) -> (i32, i32) {
    %c0_i32 = arith.constant 0 : i32
    %c0_i32_0 = arith.constant 0 : i32
    %c0_i32_1 = arith.constant 0 : i32
    return %c0_i32, %c0_i32_0 : i32, i32
  }
  func.func @transform_6(%arg0: i32) -> (i32, i32) {
    %c0_i32 = arith.constant 0 : i32
    %c0_i32_0 = arith.constant 0 : i32
    %c0_i32_1 = arith.constant 0 : i32
    return %c0_i32, %c0_i32_0 : i32, i32
  }
  func.func @transform_7(%arg0: i32) -> (i32, i32) {
    %c0_i32 = arith.constant 0 : i32
    %c0_i32_0 = arith.constant 0 : i32
    %c0_i32_1 = arith.constant 0 : i32
    return %c0_i32, %c0_i32_0 : i32, i32
  }
  func.func @transform_8(%arg0: i32) -> (i32, i32) {
    %c0_i32 = arith.constant 0 : i32
    %c0_i32_0 = arith.constant 0 : i32
    return %c0_i32, %arg0 : i32, i32
  }
  func.func @transform_9(%arg0: i32) -> (i32, i32) {
    %c0_i32 = arith.constant 0 : i32
    %c0_i32_0 = arith.constant 0 : i32
    return %c0_i32, %arg0 : i32, i32
  }
}

</mosaic_0001>

<bundles_post_ra>
// kernel: tpu_custom_call.1
= control target key start
LH: loop header
LB: loop body
LE: loop exit
PB: predicated region body
PF: predicated region fallthrough
CT: control target
= control target key end

     0   :  { %s3865_s0 = inlined_call_operand.vmem [shape: bf16[8,512], index: 0, kind: input, shape index: {}]   ;;  %s3866_s1 = inlined_call_operand.vmem [shape: f32[8,512], index: 1, kind: input, shape index: {}]   ;;  %s3867_s2 = inlined_call_operand.vmem [shape: bf16[256,8], index: 2, kind: input, shape index: {}]   ;;  %s3868_s3 = inlined_call_operand.vmem [shape: f32[256,1], index: 3, kind: input, shape index: {}]   ;;  %s3869_s4 = inlined_call_operand.vmem [shape: bf16[256,256], index: 4, kind: input, shape index: {}]   ;;  %s3870_s5 = inlined_call_operand.vmem [shape: f32[256,1], index: 5, kind: input, shape index: {}]   ;;  %s3871_s6 = inlined_call_operand.vmem [shape: bf16[16,256], index: 6, kind: input, shape index: {}]   ;;  %s3872_s7 = inlined_call_operand.vmem [shape: f32[16,1], index: 7, kind: input, shape index: {}]   ;;  %s3873_s8 = inlined_call_operand.hbm [shape: f32[8,512], index: 8, kind: output, shape index: {0}]   ;;  %s3874_s9 = inlined_call_operand.hbm [shape: f32[1,512], index: 9, kind: output, shape index: {1}]  }
   0x1   :  { %3906 = sst [smem:[#allocation24_spill]] %s3865_s0 }
   0x2   :  { %3907 = sst [smem:[#allocation25_spill]] %s3866_s1 }
   0x3   :  { %3908 = sst [smem:[#allocation26_spill]] %s3867_s2 }
   0x4   :  { %15 = vsyncpa [#allocation3], 0 }
   0x5   :  { %17 = vsyncpa [#allocation3 + $0x1], 0 }
   0x6   :  { %18 = vsyncpa [#allocation5], 0 }
   0x7   :  { %20 = vsyncpa [#allocation5 + $0x1], 0  ;;  %s2560_s30 = smov 0   ;;  %s2562_s10 = smov 0  }
   0x8   :  { %s2564_s11 = smov 0   ;;  %s2566_s12 = smov 0  }
   0x9 LB: > { %s2581_s13 = sadd.s32 4294967295, %s2504_s12   ;;  %s2204_s14 = sadd.s32 4294967294, %s2504_s12   ;;  %s2504_s12 = sphi %s2566_s12, %s3989_s12   ;;  %s2500_s11 = sphi %s2564_s11, %s3988_s11   ;;  %s2496_s10 = sphi %s2562_s10, %s3987_s10   ;;  %s2492_s30 = sphi %s2560_s30, %s3986_s30  }
   0xa   : > { %s2585_s15 = sadd.s32 1, %s2504_s12   ;;  %s211_s16 = sadd.s32 1, %s2500_s11 }
   0xb   : > { %s208_s17 = ssub.s32 %s2504_s12, %s2585_s15  ;;  %p221_p0 = scmp.ne.s32.totalorder %s2500_s11, %s2496_s10 }
   0xc   : > { %p209_p1 = scmp.eq.s32.totalorder %s208_s17, 0  ;;  %p222_p2 = scmp.eq.s32.totalorder %s2581_s13, 1 }
   0xd   : > { %p227_p3 = scmp.ne.s32.totalorder %s2496_s10, %s2492_s30  ;;  %p228_p4 = scmp.eq.s32.totalorder %s2204_s14, 1 }
   0xe   : > { %s2596_s18 = scalar_select %p209_p1, %s2500_s11, %s211_s16  }
   0xf   : > { %p2598_p5 = por %p222_p2, %p221_p0  ;;  %p2602_p6 = por %p228_p4, %p227_p3 }
  0x10   : > { %p2207_p7 = scmp.ge.s32.totalorder %s2504_s12, 1  ;;  %p308_p8 = scmp.lt.s32.totalorder %s2504_s12, 3 }
  0x12   : > { %p309_p9 = pnand %p2207_p7, %p308_p8 }
  0x14   : > { %312 = sbr.rel (%p309_p9) target bundleno = 1005 (0x3ed), region = 52 }
  0x19   : > { %s2210_s21 = sshll.u32 %s2581_s13, 1  ;;  %v2506_v0 = vmov 0   ;;  %v416_v1 = vld [vmem:[%s3868_s3 + $0x70] sm:$0xff]  ;;  %s3911_s0 = sld [smem:[#allocation24_spill]]  ;;  %v417_v2 = vld [vmem:[%s3868_s3 + $0x78] sm:$0xff]  ;;  %v414_v3 = vld [vmem:[%s3868_s3 + $0x60] sm:$0xff] }
  0x1a   : > { %p355_p10 = scmp.lt.s32.totalorder %s2210_s21, 3  ;;  %767 = vmatprep.mubr.bf16.mxu0 %v2506_v0  ;;  %2339 = vset.pattern.permute.xlu0 %v2506_v0  ;;  %vm728_vm0 = vcmask 1043456   ;;  %v415_v7 = vld [vmem:[%s3868_s3 + $0x68] sm:$0xff]  ;;  %s3912_s2 = sld [smem:[#allocation26_spill]]  ;;  %v412_v10 = vld [vmem:[%s3868_s3 + $0x50] sm:$0xff]  ;;  %vm679_vm1 = vcmask 64512  }
  0x1b   : > { %2340 = vset.pattern.permute.xlu1 %v2506_v0  ;;  %506 = vperm.xlu0 %2339, %v416_v1   ;;  %v413_v11 = vld [vmem:[%s3868_s3 + $0x58] sm:$0xff]  ;;  %v410_v12 = vld [vmem:[%s3868_s3 + $0x40] sm:$0xff]  ;;  %v411_v13 = vld [vmem:[%s3868_s3 + $0x48] sm:$0xff]  ;;  %s3985_s1 = sld [smem:[#allocation25_spill]] }
  0x1c   : > { %s3991_s21 = smov (!%p355_p10, %s2210_s21), 3  ;;  %496 = vperm.xlu1 %2340, %v414_v3   ;;  %v408_v15 = vld [vmem:[%s3868_s3 + $0x30] sm:$0xff]  ;;  %v409_v16 = vld [vmem:[%s3868_s3 + $0x38] sm:$0xff]  ;;  %v406_v17 = vld [vmem:[%s3868_s3 + $0x20] sm:$0xff] }
  0x1d   : > { %s2211_s24 = sshll.u32 %s3991_s21, 2  ;;  %v407_v18 = vld [vmem:[%s3868_s3 + $0x28] sm:$0xff]  ;;  %v404_v20 = vld [vmem:[%s3868_s3 + $0x10] sm:$0xff]  ;;  %v405_v21 = vld [vmem:[%s3868_s3 + $0x18] sm:$0xff]  ;;  %s2213_s28 = sshll.u32 %s3991_s21, 3 }
  0x1e   : > { %v402_v22 = vld [vmem:[%s3868_s3] sm:$0xff]  ;;  %v403_v23 = vld [vmem:[%s3868_s3 + $0x8] sm:$0xff]  ;;  %v432_v25 = vld [vmem:[%s3868_s3 + $0xf0] sm:$0xff]  ;;  %s2292_s21 = sshll.u32 %s2581_s13, 5 }
  0x1f   : > { %s358_s27 = scalar_lea.vmem %s3911_s0, %s2211_s24  ;;  %511 = vperm.xlu0 %2339, %v417_v2   ;;  %v433_v26 = vld [vmem:[%s3868_s3 + $0xf8] sm:$0xff]  ;;  %v430_v27 = vld [vmem:[%s3868_s3 + $0xe0] sm:$0xff]  ;;  %v431_v28 = vld [vmem:[%s3868_s3 + $0xe8] sm:$0xff]  ;;  %s2291_s24 = sshll.u32 %s2581_s13, 8 }
  0x20   : > { %v401_v4 = vld [vmem:[%s358_s27] sm:$0xff]  ;;  %501 = vperm.xlu1 %2340, %v415_v7   ;;  %v2344_v14 = vld [vmem:[%s3912_s2 + $0x8] sm:$0xff]   ;;  %v2345_v19 = vld [vmem:[%s3912_s2 + $0x10] sm:$0xff]   ;;  %s3777_s27 = sand.u32 1, %s2496_s10   ;;  %s3793_s16 = scalar_lea.hbm %s3874_s9, %s2292_s21 }
  0x21   : > { %v2231_v5 = vcombine.high %v401_v4, %v401_v4  ;;  %v2230_v6 = vcombine.low %v401_v4, %v401_v4  ;;  %v2343_v8 = vld [vmem:[%s3912_s2] sm:$0xff]   ;;  %v2346_v24 = vld [vmem:[%s3912_s2 + $0x18] sm:$0xff]   ;;  %v428_v30 = vld [vmem:[%s3868_s3 + $0xd0] sm:$0xff]  ;;  %s2209_s29 = sshll.u32 %s3777_s27, 1  ;;  %s364_s17 = scalar_lea.vmem %s3985_s1, %s2213_s28 }
  0x22   : > { %v2347_v29 = vld [vmem:[%s3912_s2 + $0x20] sm:$0xff]   ;;  %v429_v31 = vld [vmem:[%s3868_s3 + $0xd8] sm:$0xff]  ;;  %v427_v33 = vld [vmem:[%s3868_s3 + $0xc8] sm:$0xff]  ;;  %s2208_s22 = sshll.u32 %s3777_s27, 4  ;;  %s353_s23 = scalar_lea.vmem [#allocation4], %s2209_s29 }
  0x23   : > { %2232 = vmatprep.subr.msk.bf16.mxu0 %vm728_vm0, %v2231_v5  ;;  %v730_v9 = vsel %vm728_vm0, %v2230_v6, 0  ;;  %486 = vperm.xlu0 %2339, %v412_v10   ;;  %v426_v32 = vld [vmem:[%s3868_s3 + $0xc0] sm:$0xff]  ;;  %v2348_v34 = vld [vmem:[%s3912_s2 + $0x28] sm:$0xff]   ;;  %v424_v35 = vld [vmem:[%s3868_s3 + $0xb0] sm:$0xff]  ;;  %s2101_s25 = sshll.u32 %s353_s23, 4  ;;  %s3787_s26 = scalar_lea.vmem [#allocation2], %s2208_s22  ;;  %s3795_s25 = int_to_ptr.vmem [resolvable:$true] %s2101_s25 }
  0x24   : > { %750 = vmatpush1.bf16.msra.mxu0 %v730_v9  ;;  %491 = vperm.xlu1 %2340, %v413_v11   ;;  %v425_v36 = vld [vmem:[%s3868_s3 + $0xb8] sm:$0xff]  ;;  %v422_v37 = vld [vmem:[%s3868_s3 + $0xa0] sm:$0xff]  ;;  %v423_v38 = vld [vmem:[%s3868_s3 + $0xa8] sm:$0xff]  ;;  %s2087_s28 = sshll.u32 %s3787_s26, 4  ;;  %s3801_s22 = scalar_lea.hbm %s3873_s8, %s2291_s24  ;;  %s3803_s28 = int_to_ptr.vmem [resolvable:$true] %s2087_s28 }
  0x25   : > { %v2349_v39 = vld [vmem:[%s3912_s2 + $0x30] sm:$0xff]   ;;  %v421_v41 = vld [vmem:[%s3868_s3 + $0x98] sm:$0xff]  ;;  %v418_v42 = vld [vmem:[%s3868_s3 + $0x80] sm:$0xff]  ;;  %s2073_s0 = scalar_lea.sflag [#allocation5], %s3777_s27  ;;  %s2414_s1 = scalar_lea.vmem %s3795_s25, 32 }
  0x26   : > { %v420_v40 = vld [vmem:[%s3868_s3 + $0x90] sm:$0xff]  ;;  %v419_v43 = vld [vmem:[%s3868_s3 + $0x88] sm:$0xff]  ;;  %v2350_v44 = vld [vmem:[%s3912_s2 + $0x38] sm:$0xff]   ;;  %p2415_p11 = scmp.ne.s32.totalorder %s3795_s25, %s2414_s1  ;;  %s2508_s21 = smov [#allocation4]  }
  0x27   : > { %2233 = vmatmul.mubr.msk.bf16.vlgmr.msra.gmra.mxu0 %vm679_vm1, %v2343_v8  ;;  %476 = vperm.xlu0 %2339, %v410_v12   ;;  %v1198_v45 = vld [vmem:[%s3870_s5 + $0x70] sm:$0xff]  ;;  %v1199_v46 = vld [vmem:[%s3870_s5 + $0x78] sm:$0xff]  ;;  %v1196_v47 = vld [vmem:[%s3870_s5 + $0x60] sm:$0xff]  ;;  %s2418_s14 = sshll.u32 %s2508_s21, 4  ;;  %s2419_s14 = int_to_ptr.vmem [resolvable:$false] %s2418_s14 }
  0x28   : > { %777 = vmatprep.mubr.bf16.mxu0 %v2506_v0  ;;  %481 = vperm.xlu1 %2340, %v411_v13   ;;  %v1197_v48 = vld [vmem:[%s3870_s5 + $0x68] sm:$0xff]  ;;  %v2351_v49 = vld [vmem:[%s3912_s2 + $0x40] sm:$0xff]   ;;  %v1194_v50 = vld [vmem:[%s3870_s5 + $0x50] sm:$0xff]  ;;  %p2416_p12 = pnand %p2415_p11, %p2598_p5  ;;  %s2420_s29 = scalar_lea.vmem %s2419_s14, 64 }
  0x29   : > { %v1195_v51 = vld [vmem:[%s3870_s5 + $0x58] sm:$0xff]  ;;  %v1192_v52 = vld [vmem:[%s3870_s5 + $0x40] sm:$0xff]  ;;  %v1193_v53 = vld [vmem:[%s3870_s5 + $0x48] sm:$0xff]  ;;  %p2421_p0 = scmp.lt.s32.totalorder %s3795_s25, %s2419_s14  ;;  %p2422_p1 = scmp.lt.s32.totalorder %s2420_s29, %s2414_s1 }
  0x2a   : > { %v2352_v54 = vld [vmem:[%s3912_s2 + $0x48] sm:$0xff]   ;;  %v1190_v55 = vld [vmem:[%s3870_s5 + $0x30] sm:$0xff]  ;;  %v1191_v56 = vld [vmem:[%s3870_s5 + $0x38] sm:$0xff]  ;;  %p2417_p13 = pneg %p2416_p12 }
  0x2b   : > { %466 = vperm.xlu0 %2339, %v408_v15   ;;  %v1188_v57 = vld [vmem:[%s3870_s5 + $0x20] sm:$0xff]  ;;  %v1189_v58 = vld [vmem:[%s3870_s5 + $0x28] sm:$0xff]  ;;  %v2353_v59 = vld [vmem:[%s3912_s2 + $0x50] sm:$0xff]   ;;  %p2423_p2 = por %p2422_p1, %p2421_p0 }
  0x2c   : > { %471 = vperm.xlu1 %2340, %v409_v16   ;;  %v1186_v60 = vld [vmem:[%s3870_s5 + $0x10] sm:$0xff]  ;;  %v1187_v61 = vld [vmem:[%s3870_s5 + $0x18] sm:$0xff]  ;;  %v1184_v62 = vld [vmem:[%s3870_s5] sm:$0xff] }
  0x2d   : > { %v1185_v63 = vld [vmem:[%s3870_s5 + $0x8] sm:$0xff]  ;;  %v2354_v1 = vld [vmem:[%s3912_s2 + $0x58] sm:$0xff]   ;;  %v1214_v2 = vld [vmem:[%s3870_s5 + $0xf0] sm:$0xff]  ;;  %p2424_p3 = pnand %p2423_p2, %p2417_p13 }
  0x2e   : > { %v1215_v3 = vld [vmem:[%s3870_s5 + $0xf8] sm:$0xff]  ;;  %v1212_v4 = vld [vmem:[%s3870_s5 + $0xe0] sm:$0xff]  ;;  %v1213_v5 = vld [vmem:[%s3870_s5 + $0xe8] sm:$0xff] }
  0x2f   : > { %2234 = vmatmul.mubr.msk.bf16.gmra.mxu0 %vm679_vm1, %v2344_v14  ;;  %456 = vperm.xlu0 %2339, %v406_v17   ;;  %v2355_v6 = vld [vmem:[%s3912_s2 + $0x60] sm:$0xff]   ;;  %v1210_v7 = vld [vmem:[%s3870_s5 + $0xd0] sm:$0xff]  ;;  %v1211_v8 = vld [vmem:[%s3870_s5 + $0xd8] sm:$0xff] }
  0x30   : > { %787 = vmatprep.mubr.bf16.mxu0 %v2506_v0  ;;  %461 = vperm.xlu1 %2340, %v407_v18   ;;  %v1208_v9 = vld [vmem:[%s3870_s5 + $0xc0] sm:$0xff]  ;;  %v1209_v10 = vld [vmem:[%s3870_s5 + $0xc8] sm:$0xff]  ;;  %v1206_v12 = vld [vmem:[%s3870_s5 + $0xb0] sm:$0xff] }
  0x31   : > { %v2356_v11 = vld [vmem:[%s3912_s2 + $0x68] sm:$0xff]   ;;  %v1207_v13 = vld [vmem:[%s3870_s5 + $0xb8] sm:$0xff]  ;;  %v1204_v14 = vld [vmem:[%s3870_s5 + $0xa0] sm:$0xff] }
  0x32   : > { %v1205_v15 = vld [vmem:[%s3870_s5 + $0xa8] sm:$0xff]  ;;  %v2357_v16 = vld [vmem:[%s3912_s2 + $0x70] sm:$0xff]   ;;  %v1203_v18 = vld [vmem:[%s3870_s5 + $0x98] sm:$0xff] }
  0x33   : > { %446 = vperm.xlu0 %2339, %v404_v20   ;;  %v1202_v17 = vld [vmem:[%s3870_s5 + $0x90] sm:$0xff]  ;;  %v1201_v20 = vld [vmem:[%s3870_s5 + $0x88] sm:$0xff] }
  0x34   : > { %451 = vperm.xlu1 %2340, %v405_v21   ;;  %v2358_v21 = vld [vmem:[%s3912_s2 + $0x78] sm:$0xff]  }
  0x37   : > { %2235 = vmatmul.mubr.msk.bf16.gmra.mxu0 %vm679_vm1, %v2345_v19  ;;  %436 = vperm.xlu0 %2339, %v402_v22   ;;  %v1200_v19 = vld [vmem:[%s3870_s5 + $0x80] sm:$0xff] }
  0x38   : > { %797 = vmatprep.mubr.bf16.mxu0 %v2506_v0  ;;  %441 = vperm.xlu1 %2340, %v403_v23   ;;  %v1955_v22 = vld [vmem:[%s3872_s7] sm:$0xff]  ;;  %v1956_v23 = vld [vmem:[%s3872_s7 + $0x8] sm:$0xff] }
  0x3b   : > { %586 = vperm.xlu0 %2339, %v432_v25  }
  0x3c   : > { %591 = vperm.xlu1 %2340, %v433_v26  }
  0x3f   : > { %2236 = vmatmul.mubr.msk.bf16.gmra.mxu0 %vm679_vm1, %v2346_v24  ;;  %576 = vperm.xlu0 %2339, %v430_v27  }
  0x40   : > { %807 = vmatprep.mubr.bf16.mxu0 %v2506_v0  ;;  %581 = vperm.xlu1 %2340, %v431_v28  }
  0x43   : > { %566 = vperm.xlu0 %2339, %v428_v30  }
  0x44   : > { %571 = vperm.xlu1 %2340, %v429_v31  }
  0x47   : > { %2237 = vmatmul.mubr.msk.bf16.gmra.mxu0 %vm679_vm1, %v2347_v29  ;;  %556 = vperm.xlu0 %2339, %v426_v32  }
  0x48   : > { %817 = vmatprep.mubr.bf16.mxu0 %v2506_v0  ;;  %561 = vperm.xlu1 %2340, %v427_v33  }
  0x4b   : > { %546 = vperm.xlu0 %2339, %v424_v35  }
  0x4c   : > { %551 = vperm.xlu1 %2340, %v425_v36  }
  0x4f   : > { %2238 = vmatmul.mubr.msk.bf16.gmra.mxu0 %vm679_vm1, %v2348_v34  ;;  %536 = vperm.xlu0 %2339, %v422_v37  }
  0x50   : > { %827 = vmatprep.mubr.bf16.mxu0 %v2506_v0  ;;  %541 = vperm.xlu1 %2340, %v423_v38  }
  0x53   : > { %526 = vperm.xlu0 %2339, %v420_v40  }
  0x54   : > { %531 = vperm.xlu1 %2340, %v421_v41  }
  0x57   : > { %2239 = vmatmul.mubr.msk.bf16.gmra.mxu0 %vm679_vm1, %v2349_v39  ;;  %516 = vperm.xlu0 %2339, %v418_v42  }
  0x58   : > { %837 = vmatprep.mubr.bf16.mxu0 %v2506_v0  ;;  %521 = vperm.xlu1 %2340, %v419_v43  }
  0x5b   : > { %1288 = vperm.xlu0 %2339, %v1198_v45  }
  0x5c   : > { %1293 = vperm.xlu1 %2340, %v1199_v46  }
  0x5f   : > { %2240 = vmatmul.mubr.msk.bf16.gmra.mxu0 %vm679_vm1, %v2350_v44  ;;  %1278 = vperm.xlu0 %2339, %v1196_v47  }
  0x60   : > { %847 = vmatprep.mubr.bf16.mxu0 %v2506_v0  ;;  %1283 = vperm.xlu1 %2340, %v1197_v48  }
  0x63   : > { %1268 = vperm.xlu0 %2339, %v1194_v50  }
  0x64   : > { %1273 = vperm.xlu1 %2340, %v1195_v51  }
  0x67   : > { %2241 = vmatmul.mubr.msk.bf16.gmra.mxu0 %vm679_vm1, %v2351_v49  ;;  %1258 = vperm.xlu0 %2339, %v1192_v52  }
  0x68   : > { %857 = vmatprep.mubr.bf16.mxu0 %v2506_v0  ;;  %1263 = vperm.xlu1 %2340, %v1193_v53  }
  0x6b   : > { %1248 = vperm.xlu0 %2339, %v1190_v55  }
  0x6c   : > { %1253 = vperm.xlu1 %2340, %v1191_v56  }
  0x6f   : > { %2242 = vmatmul.mubr.msk.bf16.gmra.mxu0 %vm679_vm1, %v2352_v54  ;;  %1238 = vperm.xlu0 %2339, %v1188_v57  }
  0x70   : > { %867 = vmatprep.mubr.bf16.mxu0 %v2506_v0  ;;  %1243 = vperm.xlu1 %2340, %v1189_v58  }
  0x73   : > { %1228 = vperm.xlu0 %2339, %v1186_v60  }
  0x74   : > { %1233 = vperm.xlu1 %2340, %v1187_v61  }
  0x77   : > { %2243 = vmatmul.mubr.msk.bf16.gmra.mxu0 %vm679_vm1, %v2353_v59  ;;  %1218 = vperm.xlu0 %2339, %v1184_v62  }
  0x78   : > { %877 = vmatprep.mubr.bf16.mxu0 %v2506_v0  ;;  %1223 = vperm.xlu1 %2340, %v1185_v63  }
  0x7b   : > { %1368 = vperm.xlu0 %2339, %v1214_v2  }
  0x7c   : > { %1373 = vperm.xlu1 %2340, %v1215_v3  }
  0x7f   : > { %2244 = vmatmul.mubr.msk.bf16.gmra.mxu0 %vm679_vm1, %v2354_v1  ;;  %1358 = vperm.xlu0 %2339, %v1212_v4  }
  0x80   : > { %887 = vmatprep.mubr.bf16.mxu0 %v2506_v0  ;;  %1363 = vperm.xlu1 %2340, %v1213_v5  }
  0x83   : > { %1348 = vperm.xlu0 %2339, %v1210_v7  }
  0x84   : > { %1353 = vperm.xlu1 %2340, %v1211_v8  }
  0x87   : > { %2245 = vmatmul.mubr.msk.bf16.gmra.mxu0 %vm679_vm1, %v2355_v6  ;;  %1338 = vperm.xlu0 %2339, %v1208_v9  }
  0x88   : > { %897 = vmatprep.mubr.bf16.mxu0 %v2506_v0  ;;  %1343 = vperm.xlu1 %2340, %v1209_v10  }
  0x8b   : > { %1328 = vperm.xlu0 %2339, %v1206_v12  }
  0x8c   : > { %1333 = vperm.xlu1 %2340, %v1207_v13  }
  0x8f   : > { %2246 = vmatmul.mubr.msk.bf16.gmra.mxu0 %vm679_vm1, %v2356_v11  ;;  %1318 = vperm.xlu0 %2339, %v1204_v14  }
  0x90   : > { %907 = vmatprep.mubr.bf16.mxu0 %v2506_v0  ;;  %1323 = vperm.xlu1 %2340, %v1205_v15  }
  0x93   : > { %1308 = vperm.xlu0 %2339, %v1202_v17  }
  0x94   : > { %1313 = vperm.xlu1 %2340, %v1203_v18  }
  0x97   : > { %2247 = vmatmul.mubr.msk.bf16.gmra.mxu0 %vm679_vm1, %v2357_v16  ;;  %1298 = vperm.xlu0 %2339, %v1200_v19   ;;  %v2897_v24 = vpop.permute.xlu1 %496 }
  0x98   : > { %917 = vmatprep.mubr.bf16.mxu0 %v2506_v0  ;;  %1303 = vperm.xlu1 %2340, %v1201_v20   ;;  %v2895_v0 = vpop.permute.xlu0 %506 }
  0x9b   : > { %1959 = vperm.xlu0 %2339, %v1955_v22   ;;  %v2901_v26 = vpop.permute.xlu1 %501 }
  0x9c   : > { %1964 = vperm.xlu1 %2340, %v1956_v23   ;;  %v2899_v25 = vpop.permute.xlu0 %511 }
  0x9f   : > { %2248 = vmatmul.mubr.msk.bf16.gmra.mxu0 %vm679_vm1, %v2358_v21  ;;  %v2905_v28 = vpop.permute.xlu1 %491 }
  0xa0   : > { %v2903_v27 = vpop.permute.xlu0 %486 }
  0xa3   : > { %v2909_v30 = vpop.permute.xlu1 %481 }
  0xa4   : > { %v2907_v29 = vpop.permute.xlu0 %476 }
  0xa7   : > { %v2913_v32 = vpop.permute.xlu1 %471 }
  0xa8   : > { %v2911_v31 = vpop.permute.xlu0 %466 }
  0xab   : > { %v2917_v34 = vpop.permute.xlu1 %461 }
  0xac   : > { %v2915_v33 = vpop.permute.xlu0 %456 }
  0xaf   : > { %v452_v36 = vpop.permute.xlu1 %451 }
  0xb0   : > { %v447_v35 = vpop.permute.xlu0 %446 }
  0xb3   : > { %v442_v42 = vpop.permute.xlu1 %441 }
  0xb4   : > { %v437_v37 = vpop.permute.xlu0 %436 }
  0xb7   : > { %v2945_v18 = vpop.permute.xlu1 %591 }
  0xb8   : > { %v2943_v15 = vpop.permute.xlu0 %586  ;;  %3918 = vst [vmem:[#allocation13_spill] sm:$0xff] %v2945_v18 }
  0xb9   : > { %3917 = vst [vmem:[#allocation12_spill] sm:$0xff] %v2943_v15 }
  0xbb   : > { %v2949_v23 = vpop.permute.xlu1 %581 }
  0xbc   : > { %v2947_v20 = vpop.permute.xlu0 %576  ;;  %3920 = vst [vmem:[#allocation15_spill] sm:$0xff] %v2949_v23 }
  0xbd   : > { %3919 = vst [vmem:[#allocation14_spill] sm:$0xff] %v2947_v20 }
  0xe7   : > { %v769_v38 = vpop.f32.mrf.mxu0 }
  0xe8   : > { %v770_v39 = vadd.f32 %v769_v38, %v437_v37 }
  0xe9   : > { %v771_v40 = vpop.f32.mrf.mxu0 }
  0xea   : > { %v772_v41 = vadd.f32 %v771_v40, %v437_v37  ;;  %v992_v43 = vmul.f32 0.01, %v770_v39  ;;  %vm928_vm2 = vcmp.gt.f32.partialorder %v770_v39, 0.0  ;;  %v2956_v40 = vpop.permute.xlu1 %571 }
  0xeb   : > { %v773_v44 = vpop.f32.mrf.mxu0  ;;  %3922 = vst [vmem:[#allocation17_spill] sm:$0xff] %v2956_v40 }
  0xec   : > { %v774_v45 = vadd.f32 %v773_v44, %v442_v42  ;;  %v993_v47 = vmul.f32 0.01, %v772_v41  ;;  %vm929_vm4 = vcmp.gt.f32.partialorder %v772_v41, 0.0  ;;  %v2919_v51 = vsel %vm928_vm2, %v770_v39, %v992_v43  ;;  %v2361_v39 = vld [vmem:[%s3869_s4 + $0x4] ss:$8 sps:$4 sm:$0xff]  }
  0xed   : > { %v775_v46 = vpop.f32.mrf.mxu0  ;;  %3913 = vst [vmem:[#allocation8_spill] sm:$0xff] %v2919_v51  ;;  %1568 = vmatprep.mubr.bf16.mxu1 %v2361_v39 }
  0xee   : > { %vm930_vm3 = vcmp.gt.f32.partialorder %v774_v45, 0.0  ;;  %v994_v48 = vmul.f32 0.01, %v774_v45  ;;  %v776_v49 = vadd.f32 %v775_v46, %v442_v42  ;;  %v2925_v58 = vsel %vm929_vm4, %v772_v41, %v993_v47 }
  0xef   : > { %v779_v50 = vpop.f32.mrf.mxu0  ;;  %3915 = vst [vmem:[#allocation10_spill] sm:$0xff] %v2925_v58 }
  0xf0   : > { %vm931_vm5 = vcmp.gt.f32.partialorder %v776_v49, 0.0  ;;  %v995_v52 = vmul.f32 0.01, %v776_v49  ;;  %v780_v53 = vadd.f32 %v779_v50, %v447_v35  ;;  %v2921_v54 = vsel %vm930_vm3, %v774_v45, %v994_v48  ;;  %v2960_v45 = vpop.permute.xlu1 %561 }
  0xf1   : > { %3914 = vst [vmem:[#allocation9_spill] sm:$0xff] %v2921_v54  ;;  %v781_v55 = vpop.f32.mrf.mxu0  ;;  %3924 = vst [vmem:[#allocation19_spill] sm:$0xff] %v2960_v45 }
  0xf2   : > { %v782_v57 = vadd.f32 %v781_v55, %v447_v35  ;;  %v2927_v59 = vsel %vm931_vm5, %v776_v49, %v995_v52  ;;  %v996_v62 = vmul.f32 0.01, %v780_v53  ;;  %vm932_vm6 = vcmp.gt.f32.partialorder %v780_v53, 0.0 }
  0xf3   : > { %3916 = vst [vmem:[#allocation11_spill] sm:$0xff] %v2927_v59  ;;  %v783_v60 = vpop.f32.mrf.mxu0 }
  0xf4   : > { %v784_v63 = vadd.f32 %v783_v60, %v452_v36  ;;  %v997_v2 = vmul.f32 0.01, %v782_v57  ;;  %vm933_vm8 = vcmp.gt.f32.partialorder %v782_v57, 0.0  ;;  %v2931_v7 = vsel %vm932_vm6, %v780_v53, %v996_v62  ;;  %v2964_v50 = vpop.permute.xlu1 %551 }
  0xf5   : > { %v785_v1 = vpop.f32.mrf.mxu0  ;;  %3926 = vst [vmem:[#allocation21_spill] sm:$0xff] %v2964_v50 }
  0xf6   : > { %vm934_vm7 = vcmp.gt.f32.partialorder %v784_v63, 0.0  ;;  %v998_v3 = vmul.f32 0.01, %v784_v63  ;;  %v786_v4 = vadd.f32 %v785_v1, %v452_v36  ;;  %v2937_v11 = vsel %vm933_vm8, %v782_v57, %v997_v2  ;;  %v2951_v36 = vpop.permute.xlu0 %566 }
  0xf7   : > { %v789_v5 = vpop.f32.mrf.mxu0  ;;  %3921 = vst [vmem:[#allocation16_spill] sm:$0xff] %v2951_v36 }
  0xf8   : > { %vm935_vm9 = vcmp.gt.f32.partialorder %v786_v4, 0.0  ;;  %v999_v6 = vmul.f32 0.01, %v786_v4  ;;  %v2933_v8 = vsel %vm934_vm7, %v784_v63, %v998_v3  ;;  %v2978_v63 = vadd.f32 %v789_v5, %v2915_v33 }
  0xf9   : > { %v791_v9 = vpop.f32.mrf.mxu0 }
  0xfa   : > { %v2939_v12 = vsel %vm935_vm9, %v786_v4, %v999_v6  ;;  %v2958_v42 = vpop.permute.xlu0 %556  ;;  %v2967_v53 = vadd.f32 %v791_v9, %v2915_v33  ;;  %v2998_v33 = vpop.permute.xlu1 %541 }
  0xfb   : > { %v793_v13 = vpop.f32.mrf.mxu0  ;;  %3923 = vst [vmem:[#allocation18_spill] sm:$0xff] %v2958_v42  ;;  %3928 = vst [vmem:[#allocation23_spill] sm:$0xff] %v2998_v33 }
  0xfc   : > { %v2987_v4 = vmul.f32 0.01, %v2967_v53  ;;  %v2990_v6 = vadd.f32 %v793_v13, %v2917_v34 }
  0xfd   : > { %v795_v16 = vpop.f32.mrf.mxu0 }
  0xfe   : > { %v2962_v47 = vpop.permute.xlu0 %546  ;;  %v2972_v57 = vadd.f32 %v795_v16, %v2917_v34 }
  0xff   : > { %v799_v17 = vpop.f32.mrf.mxu0  ;;  %3925 = vst [vmem:[#allocation20_spill] sm:$0xff] %v2962_v47 }
 0x100   : > { %v3001_v5 = vmul.f32 0.01, %v2972_v57 }
 0x101   : > { %v801_v19 = vpop.f32.mrf.mxu0 }
 0x102   : > { %v2969_v55 = vpop.permute.xlu0 %536  ;;  %v2975_v62 = vadd.f32 %v801_v19, %v2911_v31  ;;  %v3004_v19 = vadd.f32 %v799_v17, %v2911_v31 }
 0x103   : > { %v803_v21 = vpop.f32.mrf.mxu0  ;;  %3927 = vst [vmem:[#allocation22_spill] sm:$0xff] %v2969_v55 }
 0x104   : > { %vm941_vm2 = vcmp.gt.f32.partialorder %v2975_v62, 0.0 }
 0x105   : > { %v805_v22 = vpop.f32.mrf.mxu0 }
 0x106   : > { %v2981_v1 = vadd.f32 %v805_v22, %v2913_v32  ;;  %v3024_v31 = vpop.permute.xlu0 %526 }
 0x107   : > { %v809_v35 = vpop.f32.mrf.mxu0 }
 0x108   : > { %v2984_v2 = vadd.f32 %v809_v35, %v2907_v29  ;;  %v3016_v35 = vadd.f32 %v803_v21, %v2913_v32  ;;  %vm943_vm8 = vcmp.gt.f32.partialorder %v2981_v1, 0.0 }
 0x109   : > { %v811_v37 = vpop.f32.mrf.mxu0 }
 0x10a   : > { %v2993_v9 = vadd.f32 %v811_v37, %v2907_v29  ;;  %v3013_v29 = vmul.f32 0.01, %v2975_v62  ;;  %v3030_v17 = vmul.f32 0.01, %v2984_v2  ;;  %v517_v20 = vpop.permute.xlu0 %516  ;;  %vm944_vm9 = vcmp.gt.f32.partialorder %v2984_v2, 0.0 }
 0x10b   : > { %v813_v38 = vpop.f32.mrf.mxu0 }
 0x10c   : > { %v2996_v16 = vadd.f32 %v813_v38, %v2909_v30  ;;  %v3035_v21 = vmul.f32 0.01, %v2993_v9 }
 0x10d   : > { %v815_v41 = vpop.f32.mrf.mxu0 }
 0x10e   : > { %v3007_v22 = vadd.f32 %v815_v41, %v2909_v30  ;;  %v3027_v30 = vmul.f32 0.01, %v2981_v1 }
 0x10f   : > { %v819_v43 = vpop.f32.mrf.mxu0 }
 0x110   : > { %v3010_v34 = vadd.f32 %v819_v43, %v2903_v27  ;;  %vm947_vm15 = vcmp.gt.f32.partialorder %v3007_v22, 0.0 }
 0x111   : > { %v821_v44 = vpop.f32.mrf.mxu0 }
 0x112   : > { %v3019_v37 = vadd.f32 %v821_v44, %v2903_v27  ;;  %v3038_v27 = vmul.f32 0.01, %v2996_v16  ;;  %v3048_v56 = vmul.f32 0.01, %v3010_v34  ;;  %vm948_vm3 = vcmp.gt.f32.partialorder %v3010_v34, 0.0 }
 0x113   : > { %v823_v46 = vpop.f32.mrf.mxu0 }
 0x114   : > { %v3041_v43 = vadd.f32 %v823_v46, %v2905_v28  ;;  %vm949_vm10 = vcmp.gt.f32.partialorder %v3019_v37, 0.0  ;;  %v3054_v10 = vmul.f32 0.01, %v3019_v37 }
 0x115   : > { %v825_v48 = vpop.f32.mrf.mxu0 }
 0x116   : > { %v3022_v38 = vadd.f32 %v825_v48, %v2905_v28  ;;  %v3045_v48 = vmul.f32 0.01, %v3007_v22  ;;  %vm950_vm13 = vcmp.gt.f32.partialorder %v3041_v43, 0.0 }
 0x117   : > { %v829_v49 = vpop.f32.mrf.mxu0 }
 0x118   : > { %vm951_vm11 = vcmp.gt.f32.partialorder %v3022_v38, 0.0  ;;  %v1015_v28 = vmul.f32 0.01, %v3022_v38  ;;  %v830_v14 = vadd.f32 %v829_v49, %v2897_v24 }
 0x119   : > { %v831_v52 = vpop.f32.mrf.mxu0 }
 0x11a   : > { %v832_v39 = vadd.f32 %v831_v52, %v2897_v24  ;;  %vm952_vm6 = vcmp.gt.f32.partialorder %v830_v14, 0.0  ;;  %v1016_v42 = vmul.f32 0.01, %v830_v14 }
 0x11b   : > { %v833_v60 = vpop.f32.mrf.mxu0 }
 0x11c   : > { %v834_v52 = vadd.f32 %v833_v60, %v2901_v26  ;;  %vm953_vm12 = vcmp.gt.f32.partialorder %v832_v39, 0.0 }
 0x11d   : > { %v835_v3 = vpop.f32.mrf.mxu0 }
 0x11e   : > { %v836_v41 = vadd.f32 %v835_v3, %v2901_v26  ;;  %v1017_v26 = vmul.f32 0.01, %v832_v39  ;;  %v1018_v36 = vmul.f32 0.01, %v834_v52  ;;  %vm954_vm7 = vcmp.gt.f32.partialorder %v834_v52, 0.0 }
 0x11f   : > { %v839_v13 = vpop.f32.mrf.mxu0 }
 0x120   : > { %v840_v3 = vadd.f32 %v839_v13, %v2895_v0  ;;  %v1019_v60 = vmul.f32 0.01, %v836_v41  ;;  %vm955_vm0 = vcmp.gt.f32.partialorder %v836_v41, 0.0  ;;  %v1081_v58 = vsel %vm953_vm12, %v832_v39, %v1017_v26 }
 0x121   : > { %v841_v32 = vpop.f32.mrf.mxu0  ;;  %v1082_v59 = vsel %vm954_vm7, %v834_v52, %v1018_v36  ;;  %vm942_vm12 = vcmp.gt.f32.partialorder %v3016_v35, 0.0  ;;  %vm946_vm7 = vcmp.gt.f32.partialorder %v2996_v16, 0.0  ;;  %v1006_v26 = vmul.f32 0.01, %v3016_v35 }
 0x122   : > { %v842_v44 = vadd.f32 %v841_v32, %v2895_v0  ;;  %v3059_v32 = vpop.permute.xlu1 %531  ;;  %vm956_vm5 = vcmp.gt.f32.partialorder %v840_v3, 0.0  ;;  %v1083_v33 = vsel %vm955_vm0, %v836_v41, %v1019_v60 }
 0x123   : > { %v843_v61 = vpop.f32.mrf.mxu0  ;;  %v1133_v41 = vpack.c.bf16 %v1083_v33, %v1081_v58  ;;  %v1077_v58 = vsel %vm949_vm10, %v3019_v37, %v3054_v10  ;;  %vm3929_vm10 = vcmp.gt.f32.partialorder %v2993_v9, 0.0 }
 0x124   : > { %v844_v46 = vadd.f32 %v843_v61, %v2899_v25  ;;  %v1021_v13 = vmul.f32 0.01, %v842_v44  ;;  %v1020_v61 = vmul.f32 0.01, %v840_v3  ;;  %vm957_vm1 = vcmp.gt.f32.partialorder %v842_v44, 0.0 }
 0x125   : > { %v845_v0 = vpop.f32.mrf.mxu0 }
 0x126   : > { %v1022_v40 = vmul.f32 0.01, %v844_v46  ;;  %v846_v18 = vadd.f32 %v845_v0, %v2899_v25  ;;  %vm958_vm14 = vcmp.gt.f32.partialorder %v844_v46, 0.0  ;;  %v1085_v50 = vsel %vm957_vm1, %v842_v44, %v1021_v13  ;;  %v522_v23 = vpop.permute.xlu1 %521 }
 0x127   : > { %v849_v45 = vpop.f32.mrf.mxu0  ;;  %v1084_v54 = vsel %vm956_vm5, %v840_v3, %v1020_v61  ;;  %v1080_v44 = vsel %vm952_vm6, %v830_v14, %v1016_v42  ;;  %vm939_vm1 = vcmp.gt.f32.partialorder %v2972_v57, 0.0  ;;  %vm937_vm6 = vcmp.gt.f32.partialorder %v2967_v53, 0.0 }
 0x128   : > { %v1023_v24 = vmul.f32 0.01, %v846_v18  ;;  %v850_v49 = vadd.f32 %v849_v45, %v517_v20  ;;  %vm959_vm4 = vcmp.gt.f32.partialorder %v846_v18, 0.0  ;;  %v1086_v0 = vsel %vm958_vm14, %v844_v46, %v1022_v40 }
 0x129   : > { %v851_v25 = vpop.f32.mrf.mxu0  ;;  %v1134_v46 = vpack.c.bf16 %v1086_v0, %v1084_v54  ;;  %v1074_v61 = vsel %vm946_vm7, %v2996_v16, %v3038_v27  ;;  %v1004_v16 = vmul.f32 0.01, %v3004_v19 }
 0x12a   : > { %v852_v15 = vadd.f32 %v851_v25, %v517_v20  ;;  %v1087_v47 = vsel %vm959_vm4, %v846_v18, %v1023_v24  ;;  %v1024_v55 = vmul.f32 0.01, %v850_v49  ;;  %vm960_vm14 = vcmp.gt.f32.partialorder %v850_v49, 0.0 }
 0x12b   : > { %v853_v45 = vpop.f32.mrf.mxu0  ;;  %v1135_v51 = vpack.c.bf16 %v1087_v47, %v1085_v50  ;;  %v1014_v20 = vmul.f32 0.01, %v3041_v43  ;;  %v1079_v47 = vsel %vm951_vm11, %v3022_v38, %v1015_v28  ;;  %vm940_vm11 = vcmp.gt.f32.partialorder %v3004_v19, 0.0 }
 0x12c   : > { %v854_v40 = vadd.f32 %v853_v45, %v522_v23  ;;  %v1025_v50 = vmul.f32 0.01, %v852_v15  ;;  %vm961_vm4 = vcmp.gt.f32.partialorder %v852_v15, 0.0  ;;  %v3087_v14 = vsel %vm960_vm14, %v850_v49, %v1024_v55 }
 0x12d   : > { %v855_v18 = vpop.f32.mrf.mxu0  ;;  %1536 = vmatprep.subr.bf16.mxu1 %v1135_v51  ;;  %v1132_v51 = vpack.c.bf16 %v1082_v59, %v1080_v44  ;;  %v1131_v33 = vpack.c.bf16 %v1079_v47, %v1077_v58  ;;  %v1078_v10 = vsel %vm950_vm13, %v3041_v43, %v1014_v20  ;;  %v1075_v38 = vsel %vm947_vm15, %v3007_v22, %v3045_v48 }
 0x12e   : > { %vm962_vm0 = vcmp.gt.f32.partialorder %v854_v40, 0.0  ;;  %v1026_v39 = vmul.f32 0.01, %v854_v40  ;;  %v856_v3 = vadd.f32 %v855_v18, %v522_v23  ;;  %1537 = vmatpush1.bf16.msra.mxu1 %v1134_v46  ;;  %v3106_v52 = vsel %vm961_vm4, %v852_v15, %v1025_v50 }
 0x12f   : > { %v859_v54 = vpop.f32.mrf.mxu0  ;;  %1538 = vmatprep.subr.bf16.mxu1 %v1133_v41  ;;  %v1073_v43 = vsel %vm3929_vm10, %v2993_v9, %v3035_v21  ;;  %v1072_v9 = vsel %vm944_vm9, %v2984_v2, %v3030_v17  ;;  %v1069_v2 = vsel %vm941_vm2, %v2975_v62, %v3013_v29  ;;  %v1070_v46 = vsel %vm942_vm12, %v3016_v35, %v1006_v26 }
 0x130   : > { %vm963_vm5 = vcmp.gt.f32.partialorder %v856_v3, 0.0  ;;  %v1027_v36 = vmul.f32 0.01, %v856_v3  ;;  %v860_v23 = vadd.f32 %v859_v54, %v3024_v31  ;;  %v3091_v42 = vsel %vm962_vm0, %v854_v40, %v1026_v39 }
 0x131   : > { %v861_v59 = vpop.f32.mrf.mxu0  ;;  %v1136_v55 = vpack.c.bf16 %v3091_v42, %v3087_v14  ;;  %v1128_v0 = vpack.c.bf16 %v1074_v61, %v1072_v9  ;;  %vm938_vm2 = vcmp.gt.f32.partialorder %v2990_v6, 0.0  ;;  %v1067_v62 = vsel %vm939_vm1, %v2972_v57, %v3001_v5  ;;  %v3939_v9 = vld [vmem:[#allocation15_spill] sm:$0xff] }
 0x132   : > { %v862_v37 = vadd.f32 %v861_v59, %v3024_v31  ;;  %1539 = vmatpush1.bf16.msra.mxu1 %v1132_v51  ;;  %v3108_v28 = vsel %vm963_vm5, %v856_v3, %v1027_v36  ;;  %v1076_v31 = vsel %vm948_vm3, %v3010_v34, %v3048_v56  ;;  %v1028_v22 = vmul.f32 0.01, %v860_v23  ;;  %v3932_v59 = vld [vmem:[#allocation11_spill] sm:$0xff] }
 0x133   : > { %v863_v60 = vpop.f32.mrf.mxu0  ;;  %1540 = vmatprep.subr.bf16.mxu1 %v1131_v33  ;;  %v1137_v15 = vpack.c.bf16 %v3108_v28, %v3106_v52  ;;  %v1130_v13 = vpack.c.bf16 %v1078_v10, %v1076_v31  ;;  %vm964_vm13 = vcmp.gt.f32.partialorder %v860_v23, 0.0  ;;  %v1129_v56 = vpack.c.bf16 %v1075_v38, %v1073_v43  ;;  %v3933_v33 = vld [vmem:[#allocation10_spill] sm:$0xff]  ;;  %v3936_v38 = vld [vmem:[#allocation8_spill] sm:$0xff] }
 0x134   : > { %v864_v48 = vadd.f32 %v863_v60, %v3059_v32  ;;  %v1071_v34 = vsel %vm943_vm8, %v2981_v1, %v3027_v30  ;;  %v1029_v21 = vmul.f32 0.01, %v862_v37  ;;  %vm965_vm3 = vcmp.gt.f32.partialorder %v862_v37, 0.0  ;;  %v2365_v52 = vld [vmem:[%s3869_s4 + $0x24] ss:$8 sps:$4 sm:$0xff]  }
 0x135   : > { %v865_v24 = vpop.f32.mrf.mxu0  ;;  %v3143_v30 = vsel %vm964_vm13, %v860_v23, %v1028_v22  ;;  %v1127_v40 = vpack.c.bf16 %v1071_v34, %v1069_v2  ;;  %v1000_v41 = vmul.f32 0.01, %v2978_v63  ;;  %v1068_v35 = vsel %vm940_vm11, %v3004_v19, %v1004_v16  ;;  %v3941_v16 = vld [vmem:[#allocation20_spill] sm:$0xff]  ;;  %v3942_v2 = vld [vmem:[#allocation21_spill] sm:$0xff]  ;;  %v2368_v42 = vld [vmem:[%s3869_s4 + $0x34] ss:$8 sps:$4 sm:$0xff]  }
 0x136   : > { %vm966_vm15 = vcmp.gt.f32.partialorder %v864_v48, 0.0  ;;  %v1030_v49 = vmul.f32 0.01, %v864_v48  ;;  %v866_v25 = vadd.f32 %v865_v24, %v3059_v32  ;;  %1541 = vmatpush1.bf16.msra.mxu1 %v1130_v13  ;;  %v1002_v32 = vmul.f32 0.01, %v2990_v6  ;;  %v3938_v24 = vld [vmem:[#allocation22_spill] sm:$0xff] }
 0x137   : > { %v3136_v27 = vpop.f32.mrf.mxu0  ;;  %1542 = vmatprep.subr.bf16.mxu1 %v1129_v56  ;;  %v3159_v29 = vsel %vm965_vm3, %v862_v37, %v1029_v21  ;;  %vm936_vm8 = vcmp.gt.f32.partialorder %v2978_v63, 0.0  ;;  %v1126_v50 = vpack.c.bf16 %v1070_v46, %v1068_v35  ;;  %v1065_v57 = vsel %vm937_vm6, %v2967_v53, %v2987_v4  ;;  %v3935_v37 = vld [vmem:[#allocation9_spill] sm:$0xff]  ;;  %v3944_v46 = vld [vmem:[#allocation18_spill] sm:$0xff]  ;;  %v2367_v14 = vld [vmem:[%s3869_s4 + $0x20] ss:$8 sps:$4 sm:$0xff]  }
 0x138   : > { %vm967_vm9 = vcmp.gt.f32.partialorder %v866_v25, 0.0  ;;  %v1031_v1 = vmul.f32 0.01, %v866_v25  ;;  %v3145_v17 = vsel %vm966_vm15, %v864_v48, %v1030_v49  ;;  %v1125_v39 = vpack.c.bf16 %v1067_v62, %v1065_v57  ;;  %v3940_v49 = vld [vmem:[#allocation23_spill] sm:$0xff]  ;;  %v3946_v57 = vld [vmem:[#allocation16_spill] sm:$0xff] }
 0x139   : > { %v871_v45 = vpop.f32.mrf.mxu0  ;;  %v1138_v20 = vpack.c.bf16 %v3145_v17, %v3143_v30  ;;  %v1066_v3 = vsel %vm938_vm2, %v2990_v6, %v1002_v32  ;;  %v1064_v19 = vsel %vm936_vm8, %v2978_v63, %v1000_v41  ;;  %v3930_v23 = vpack.c.bf16 %v2939_v12, %v2937_v11  ;;  %v3943_v32 = vld [vmem:[#allocation12_spill] sm:$0xff]  ;;  %v3945_v41 = vld [vmem:[#allocation19_spill] sm:$0xff]  ;;  %v2364_v30 = vld [vmem:[%s3869_s4 + $0x10] ss:$8 sps:$4 sm:$0xff]  }
 0x13a   : > { %1543 = vmatpush1.bf16.msra.mxu1 %v1128_v0  ;;  %v3161_v18 = vsel %vm967_vm9, %v866_v25, %v1031_v1  ;;  %v1124_v51 = vpack.c.bf16 %v1066_v3, %v1064_v19  ;;  %v3931_v4 = vpack.c.bf16 %v2933_v8, %v2931_v7  ;;  %v3934_v10 = vpack.c.bf16 %v3932_v59, %v3933_v33  ;;  %v3947_v19 = vld [vmem:[#allocation14_spill] sm:$0xff]  ;;  %v2371_v28 = vld [vmem:[%s3869_s4 + $0x44] ss:$8 sps:$4 sm:$0xff]  }
 0x13b   : > { %v873_v44 = vpop.f32.mrf.mxu0  ;;  %1544 = vmatprep.subr.bf16.mxu1 %v1127_v40  ;;  %v1139_v47 = vpack.c.bf16 %v3161_v18, %v3159_v29  ;;  %v3937_v26 = vpack.c.bf16 %v3935_v37, %v3936_v38  ;;  %v3197_v56 = vadd.f32 %v871_v45, %v3938_v24  ;;  %v2362_v29 = vld [vmem:[%s3869_s4 + $0x14] ss:$8 sps:$4 sm:$0xff]   ;;  %v2377_v18 = vld [vmem:[%s3869_s4 + $0x64] ss:$8 sps:$4 sm:$0xff]  }
 0x13c   : > { %v3201_v25 = vadd.f32 %v873_v44, %v3940_v49  ;;  %v2374_v17 = vld [vmem:[%s3869_s4 + $0x54] ss:$8 sps:$4 sm:$0xff]  }
 0x13d   : > { %v3174_v5 = vpop.f32.mrf.mxu0 }
 0x13e   : > { %1545 = vmatpush1.bf16.msra.mxu1 %v1126_v50 }
 0x13f   : > { %v3177_v54 = vpop.f32.mrf.mxu0  ;;  %1546 = vmatprep.subr.bf16.mxu1 %v1125_v39 }
 0x141   : > { %v881_v58 = vpop.f32.mrf.mxu0 }
 0x142   : > { %1547 = vmatpush1.bf16.msra.mxu1 %v1124_v51  ;;  %v3204_v0 = vadd.f32 %v881_v58, %v3941_v16  ;;  %v3948_v58 = vld [vmem:[#allocation13_spill] sm:$0xff] }
 0x143   : > { %v883_v36 = vpop.f32.mrf.mxu0  ;;  %1548 = vmatprep.subr.bf16.mxu1 %v3930_v23  ;;  %v3949_v23 = vld [vmem:[#allocation17_spill] sm:$0xff] }
 0x144   : > { %v3207_v1 = vadd.f32 %v883_v36, %v3942_v2 }
 0x145   : > { %v3183_v53 = vpop.f32.mrf.mxu0 }
 0x146   : > { %1549 = vmatpush1.bf16.msra.mxu1 %v3931_v4 }
 0x147   : > { %v3188_v6 = vpop.f32.mrf.mxu0  ;;  %1550 = vmatprep.subr.bf16.mxu1 %v3934_v10 }
 0x149   : > { %v891_v63 = vpop.f32.mrf.mxu0 }
 0x14a   : > { %1551 = vmatpush1.bf16.msra.mxu1 %v3937_v26  ;;  %v3211_v62 = vadd.f32 %v891_v63, %v3944_v46 }
 0x14b   : > { %v893_v60 = vpop.f32.mrf.mxu0 }
 0x14c   : > { %v3214_v45 = vadd.f32 %v893_v60, %v3945_v41  ;;  %vm977_vm9 = vcmp.gt.f32.partialorder %v3211_v62, 0.0 }
 0x14d   : > { %v895_v11 = vpop.f32.mrf.mxu0 }
 0x14e   : > { %v3217_v35 = vadd.f32 %v895_v11, %v3945_v41  ;;  %vm978_vm2 = vcmp.gt.f32.partialorder %v3214_v45, 0.0 }
 0x14f   : > { %v899_v12 = vpop.f32.mrf.mxu0 }
 0x150   : > { %v3221_v39 = vadd.f32 %v899_v12, %v3946_v57  ;;  %vm979_vm15 = vcmp.gt.f32.partialorder %v3217_v35, 0.0 }
 0x151   : > { %v901_v31 = vpop.f32.mrf.mxu0 }
 0x152   : > { %v902_v3 = vadd.f32 %v901_v31, %v3946_v57  ;;  %vm980_vm3 = vcmp.gt.f32.partialorder %v3221_v39, 0.0 }
 0x153   : > { %v903_v43 = vpop.f32.mrf.mxu0 }
 0x154   : > { %v904_v4 = vadd.f32 %v903_v43, %v3949_v23  ;;  %vm981_vm10 = vcmp.gt.f32.partialorder %v902_v3, 0.0 }
 0x155   : > { %v905_v22 = vpop.f32.mrf.mxu0 }
 0x156   : > { %v906_v59 = vadd.f32 %v905_v22, %v3949_v23  ;;  %v1046_v57 = vmul.f32 0.01, %v904_v4  ;;  %vm982_vm13 = vcmp.gt.f32.partialorder %v904_v4, 0.0 }
 0x157   : > { %v909_v48 = vpop.f32.mrf.mxu0 }
 0x158   : > { %v910_v60 = vadd.f32 %v909_v48, %v3947_v19  ;;  %v1047_v43 = vmul.f32 0.01, %v906_v59  ;;  %vm983_vm6 = vcmp.gt.f32.partialorder %v906_v59, 0.0  ;;  %v1045_v48 = vmul.f32 0.01, %v902_v3 }
 0x159   : > { %v911_v7 = vpop.f32.mrf.mxu0 }
 0x15a   : > { %v912_v51 = vadd.f32 %v911_v7, %v3947_v19  ;;  %vm984_vm7 = vcmp.gt.f32.partialorder %v910_v60, 0.0 }
 0x15b   : > { %v913_v8 = vpop.f32.mrf.mxu0 }
 0x15c   : > { %v914_v33 = vadd.f32 %v913_v8, %v3939_v9  ;;  %v1049_v12 = vmul.f32 0.01, %v912_v51  ;;  %vm985_vm11 = vcmp.gt.f32.partialorder %v912_v51, 0.0 }
 0x15d   : > { %v915_v13 = vpop.f32.mrf.mxu0 }
 0x15e   : > { %v916_v34 = vadd.f32 %v915_v13, %v3939_v9  ;;  %v1050_v22 = vmul.f32 0.01, %v914_v33  ;;  %vm986_vm5 = vcmp.gt.f32.partialorder %v914_v33, 0.0  ;;  %v1048_v9 = vmul.f32 0.01, %v910_v60 }
 0x15f   : > { %v919_v61 = vpop.f32.mrf.mxu0 }
 0x160   : > { %v920_v44 = vadd.f32 %v919_v61, %v3943_v32  ;;  %v1051_v10 = vmul.f32 0.01, %v916_v34  ;;  %vm987_vm12 = vcmp.gt.f32.partialorder %v916_v34, 0.0  ;;  %v1112_v23 = vsel %vm984_vm7, %v910_v60, %v1048_v9 }
 0x161   : > { %v921_v21 = vpop.f32.mrf.mxu0 }
 0x162   : > { %v922_v40 = vadd.f32 %v921_v21, %v3943_v32  ;;  %v1052_v11 = vmul.f32 0.01, %v920_v44  ;;  %vm988_vm1 = vcmp.gt.f32.partialorder %v920_v44, 0.0  ;;  %v1115_v61 = vsel %vm987_vm12, %v916_v34, %v1051_v10 }
 0x163   : > { %v923_v50 = vpop.f32.mrf.mxu0  ;;  %v1111_v34 = vsel %vm983_vm6, %v906_v59, %v1047_v43  ;;  %v1042_v59 = vmul.f32 0.01, %v3214_v45  ;;  %vm973_vm12 = vcmp.gt.f32.partialorder %v3204_v0, 0.0 }
 0x164   : > { %v924_v36 = vadd.f32 %v923_v50, %v3948_v58  ;;  %v1053_v37 = vmul.f32 0.01, %v922_v40  ;;  %vm989_vm0 = vcmp.gt.f32.partialorder %v922_v40, 0.0  ;;  %v1116_v32 = vsel %vm988_vm1, %v920_v44, %v1052_v11 }
 0x165   : > { %v925_v63 = vpop.f32.mrf.mxu0  ;;  %v1113_v50 = vsel %vm985_vm11, %v912_v51, %v1049_v12  ;;  %v890_v44 = vadd.f32 %v3188_v6, %v3944_v46  ;;  %v1044_v51 = vmul.f32 0.01, %v3221_v39  ;;  %v1110_v6 = vsel %vm982_vm13, %v904_v4, %v1046_v57  ;;  %v2386_v57 = vld [vmem:[%s3869_s4 + $0x94] ss:$8 sps:$4 sm:$0xff]  }
 0x166   : > { %vm990_vm14 = vcmp.gt.f32.partialorder %v924_v36, 0.0  ;;  %v1054_v38 = vmul.f32 0.01, %v924_v36  ;;  %v926_v26 = vadd.f32 %v925_v63, %v3948_v58  ;;  %v1117_v8 = vsel %vm989_vm0, %v922_v40, %v1053_v37 }
 0x167   : > { %v1149_v19 = vpack.c.bf16 %v1115_v61, %v1113_v50  ;;  %v1114_v58 = vsel %vm986_vm5, %v914_v33, %v1050_v22  ;;  %v1043_v40 = vmul.f32 0.01, %v3217_v35  ;;  %v1041_v33 = vmul.f32 0.01, %v3211_v62  ;;  %v2385_v50 = vld [vmem:[%s3869_s4 + $0x80] ss:$8 sps:$4 sm:$0xff]  }
 0x168   : > { %vm991_vm4 = vcmp.gt.f32.partialorder %v926_v26, 0.0  ;;  %v1055_v31 = vmul.f32 0.01, %v926_v26  ;;  %v1118_v7 = vsel %vm990_vm14, %v924_v36, %v1054_v38  ;;  %v886_v36 = vadd.f32 %v3183_v53, %v3942_v2 }
 0x169   : > { %v1150_v41 = vpack.c.bf16 %v1118_v7, %v1116_v32  ;;  %v1148_v53 = vpack.c.bf16 %v1114_v58, %v1112_v23  ;;  %v1109_v2 = vsel %vm981_vm10, %v902_v3, %v1045_v48  ;;  %v876_v46 = vadd.f32 %v3174_v5, %v3940_v49  ;;  %v2389_v58 = vld [vmem:[%s3869_s4 + $0xa4] ss:$8 sps:$4 sm:$0xff]   ;;  %v2398_v23 = vld [vmem:[%s3869_s4 + $0xd4] ss:$8 sps:$4 sm:$0xff]  }
 0x16a   : > { %v1119_v13 = vsel %vm991_vm4, %v926_v26, %v1055_v31  ;;  %v1147_v10 = vpack.c.bf16 %v1111_v34, %v1109_v2  ;;  %v1039_v63 = vmul.f32 0.01, %v886_v36  ;;  %v1107_v37 = vsel %vm979_vm15, %v3217_v35, %v1043_v40  ;;  %v2392_v40 = vld [vmem:[%s3869_s4 + $0xb4] ss:$8 sps:$4 sm:$0xff]   ;;  %v2394_v34 = vld [vmem:[%s3869_s4 + $0xb0] ss:$8 sps:$4 sm:$0xff]  }
 0x16b   : > { %v1151_v21 = vpack.c.bf16 %v1119_v13, %v1117_v8  ;;  %v880_v3 = vadd.f32 %v3177_v54, %v3941_v16  ;;  %vm975_vm8 = vcmp.gt.f32.partialorder %v886_v36, 0.0  ;;  %v1040_v38 = vmul.f32 0.01, %v890_v44  ;;  %v2403_v2 = vld [vmem:[%s3869_s4 + $0xe0] ss:$8 sps:$4 sm:$0xff]  }
 0x16c   : > { %v1108_v4 = vsel %vm980_vm3, %v3221_v39, %v1044_v51  ;;  %v1037_v5 = vmul.f32 0.01, %v3204_v0  ;;  %vm976_vm14 = vcmp.gt.f32.partialorder %v890_v44, 0.0  ;;  %v1105_v26 = vsel %vm977_vm9, %v3211_v62, %v1041_v33  ;;  %v2397_v51 = vld [vmem:[%s3869_s4 + $0xc0] ss:$8 sps:$4 sm:$0xff]  }
 0x16d   : > { %1552 = vmatprep.subr.bf16.mxu1 %v1151_v21  ;;  %v1146_v49 = vpack.c.bf16 %v1110_v6, %v1108_v4  ;;  %v1038_v35 = vmul.f32 0.01, %v3207_v1  ;;  %v1145_v54 = vpack.c.bf16 %v1107_v37, %v1105_v26  ;;  %v1106_v16 = vsel %vm978_vm2, %v3214_v45, %v1042_v59  ;;  %v2400_v33 = vld [vmem:[%s3869_s4 + $0xd0] ss:$8 sps:$4 sm:$0xff]   ;;  %v2404_v59 = vld [vmem:[%s3869_s4 + $0xf4] ss:$8 sps:$4 sm:$0xff]   ;;  %v3382_v6 = vpop.permute.xlu0 %1288 }
 0x16e   : > { %1553 = vmatpush2.bf16.msra.mxu1 %v1150_v41  ;;  %v1035_v60 = vmul.f32 0.01, %v876_v46  ;;  %vm974_vm0 = vcmp.gt.f32.partialorder %v3207_v1, 0.0  ;;  %v1103_v39 = vsel %vm975_vm8, %v886_v36, %v1039_v63  ;;  %v870_v11 = vadd.f32 %v3136_v27, %v3938_v24  ;;  %v2383_v41 = vld [vmem:[%s3869_s4 + $0x84] ss:$8 sps:$4 sm:$0xff]  }
 0x16f   : > { %1554 = vmatprep.subr.bf16.mxu1 %v1149_v19  ;;  %vm971_vm1 = vcmp.gt.f32.partialorder %v876_v46, 0.0  ;;  %v1036_v12 = vmul.f32 0.01, %v880_v3  ;;  %v1104_v31 = vsel %vm976_vm14, %v890_v44, %v1040_v38  ;;  %v1033_v62 = vmul.f32 0.01, %v3197_v56 }
 0x170   : > { %vm972_vm4 = vcmp.gt.f32.partialorder %v880_v3, 0.0  ;;  %v1144_v43 = vpack.c.bf16 %v1106_v16, %v1104_v31  ;;  %v1101_v45 = vsel %vm973_vm12, %v3204_v0, %v1037_v5  ;;  %vm969_vm11 = vcmp.gt.f32.partialorder %v3197_v56, 0.0  ;;  %v2388_v19 = vld [vmem:[%s3869_s4 + $0x90] ss:$8 sps:$4 sm:$0xff]   ;;  %v2391_v36 = vld [vmem:[%s3869_s4 + $0xa0] ss:$8 sps:$4 sm:$0xff]  }
 0x171   : > { %v1034_v22 = vmul.f32 0.01, %v3201_v25  ;;  %v1143_v7 = vpack.c.bf16 %v1103_v39, %v1101_v45  ;;  %v1102_v8 = vsel %vm974_vm0, %v3207_v1, %v1038_v35  ;;  %vm970_vm5 = vcmp.gt.f32.partialorder %v3201_v25, 0.0  ;;  %v2382_v1 = vld [vmem:[%s3869_s4 + $0x70] ss:$8 sps:$4 sm:$0xff]   ;;  %v3386_v63 = vpop.permute.xlu0 %1278 }
 0x172   : > { %1555 = vmatpush2.bf16.msra.mxu1 %v1148_v53  ;;  %v1099_v27 = vsel %vm971_vm1, %v876_v46, %v1035_v60  ;;  %v1032_v24 = vmul.f32 0.01, %v870_v11  ;;  %v1100_v13 = vsel %vm972_vm4, %v880_v3, %v1036_v12  ;;  %vm968_vm6 = vcmp.gt.f32.partialorder %v870_v11, 0.0  ;;  %v2395_v44 = vld [vmem:[%s3869_s4 + $0xc4] ss:$8 sps:$4 sm:$0xff]   ;;  %v3384_v46 = vpop.permute.xlu1 %1293 }
 0x173   : > { %1556 = vmatprep.subr.bf16.mxu1 %v1147_v10  ;;  %v1142_v61 = vpack.c.bf16 %v1102_v8, %v1100_v13  ;;  %v1097_v9 = vsel %vm969_vm11, %v3197_v56, %v1033_v62  ;;  %v1098_v0 = vsel %vm970_vm5, %v3201_v25, %v1034_v22  ;;  %v2359_v56 = vld [vmem:[%s3869_s4] ss:$8 sps:$4 sm:$0xff]   ;;  %v2380_v25 = vld [vmem:[%s3869_s4 + $0x74] ss:$8 sps:$4 sm:$0xff]   ;;  %v2401_v53 = vld [vmem:[%s3869_s4 + $0xe4] ss:$8 sps:$4 sm:$0xff]  }
 0x174   : > { %v1141_v21 = vpack.c.bf16 %v1099_v27, %v1097_v9  ;;  %v1096_v32 = vsel %vm968_vm6, %v870_v11, %v1032_v24  ;;  %v2406_v10 = vld [vmem:[%s3869_s4 + $0xf0] ss:$8 sps:$4 sm:$0xff]  }
 0x175   : > { %v1140_v48 = vpack.c.bf16 %v1098_v0, %v1096_v32  ;;  %v3390_v3 = vpop.permute.xlu0 %1268 }
 0x176   : > { %1557 = vmatpush2.bf16.msra.mxu1 %v1146_v49  ;;  %v3388_v37 = vpop.permute.xlu1 %1283 }
 0x177   : > { %1558 = vmatprep.subr.bf16.mxu1 %v1145_v54 }
 0x179   : > { %v3394_v4 = vpop.permute.xlu0 %1258 }
 0x17a   : > { %1559 = vmatpush2.bf16.msra.mxu1 %v1144_v43  ;;  %v3392_v38 = vpop.permute.xlu1 %1273 }
 0x17b   : > { %1560 = vmatprep.subr.bf16.mxu1 %v1143_v7 }
 0x17d   : > { %v3398_v49 = vpop.permute.xlu0 %1248 }
 0x17e   : > { %1561 = vmatpush2.bf16.msra.mxu1 %v1142_v61  ;;  %v3396_v5 = vpop.permute.xlu1 %1263 }
 0x17f   : > { %1562 = vmatprep.subr.bf16.mxu1 %v1141_v21 }
 0x181   : > { %v3402_v35 = vpop.permute.xlu0 %1238 }
 0x182   : > { %1563 = vmatpush2.bf16.msra.mxu1 %v1140_v48  ;;  %v3400_v26 = vpop.permute.xlu1 %1253 }
 0x183   : > { %1564 = vmatprep.subr.bf16.mxu1 %v1139_v47  ;;  %v2379_v47 = vld [vmem:[%s3869_s4 + $0x60] ss:$8 sps:$4 sm:$0xff]  }
 0x185   : > { %v1229_v16 = vpop.permute.xlu0 %1228 }
 0x186   : > { %1565 = vmatpush2.bf16.msra.mxu1 %v1138_v20  ;;  %v2376_v20 = vld [vmem:[%s3869_s4 + $0x50] ss:$8 sps:$4 sm:$0xff]   ;;  %v3404_v54 = vpop.permute.xlu1 %1243 }
 0x187   : > { %1566 = vmatprep.subr.bf16.mxu1 %v1137_v15  ;;  %v2373_v15 = vld [vmem:[%s3869_s4 + $0x40] ss:$8 sps:$4 sm:$0xff]  }
 0x189   : > { %v1219_v39 = vpop.permute.xlu0 %1218 }
 0x18a   : > { %1567 = vmatpush2.bf16.msra.mxu1 %v1136_v55  ;;  %v2370_v55 = vld [vmem:[%s3869_s4 + $0x30] ss:$8 sps:$4 sm:$0xff]   ;;  %v1234_v60 = vpop.permute.xlu1 %1233 }
 0x18d   : > { %1569 = vmatmul.mubr.bf16.vlgmr.msra.gmra.mxu1 %v2359_v56 }
 0x18e   : > { %1578 = vmatprep.mubr.bf16.mxu1 %v2362_v29  ;;  %v1224_v43 = vpop.permute.xlu1 %1223 }
 0x195   : > { %1579 = vmatmul.mubr.bf16.gmra.mxu1 %v2364_v30 }
 0x196   : > { %1588 = vmatprep.mubr.bf16.mxu1 %v2365_v52 }
 0x19d   : > { %1589 = vmatmul.mubr.bf16.gmra.mxu1 %v2367_v14 }
 0x19e   : > { %1598 = vmatprep.mubr.bf16.mxu1 %v2368_v42 }
 0x1a5   : > { %1599 = vmatmul.mubr.bf16.gmra.mxu1 %v2370_v55 }
 0x1a6   : > { %1608 = vmatprep.mubr.bf16.mxu1 %v2371_v28 }
 0x1ad   : > { %1609 = vmatmul.mubr.bf16.gmra.mxu1 %v2373_v15 }
 0x1ae   : > { %1618 = vmatprep.mubr.bf16.mxu1 %v2374_v17 }
 0x1b5   : > { %1619 = vmatmul.mubr.bf16.gmra.mxu1 %v2376_v20 }
 0x1b6   : > { %1628 = vmatprep.mubr.bf16.mxu1 %v2377_v18 }
 0x1bd   : > { %1629 = vmatmul.mubr.bf16.gmra.mxu1 %v2379_v47 }
 0x1be   : > { %1638 = vmatprep.mubr.bf16.mxu1 %v2380_v25 }
 0x1c5   : > { %1639 = vmatmul.mubr.bf16.gmra.mxu1 %v2382_v1 }
 0x1c6   : > { %1648 = vmatprep.mubr.bf16.mxu1 %v2383_v41 }
 0x1cd   : > { %1649 = vmatmul.mubr.bf16.gmra.mxu1 %v2385_v50 }
 0x1ce   : > { %1658 = vmatprep.mubr.bf16.mxu1 %v2386_v57 }
 0x1d5   : > { %1659 = vmatmul.mubr.bf16.gmra.mxu1 %v2388_v19 }
 0x1d6   : > { %1668 = vmatprep.mubr.bf16.mxu1 %v2389_v58 }
 0x1dd   : > { %1669 = vmatmul.mubr.bf16.gmra.mxu1 %v2391_v36 }
 0x1de   : > { %1678 = vmatprep.mubr.bf16.mxu1 %v2392_v40 }
 0x1e5   : > { %1679 = vmatmul.mubr.bf16.gmra.mxu1 %v2394_v34  ;;  %v3430_v34 = vpop.permute.xlu0 %1368 }
 0x1e6   : > { %1688 = vmatprep.mubr.bf16.mxu1 %v2395_v44  ;;  %3953 = vst [vmem:[#allocation8_spill] sm:$0xff] %v3430_v34 }
 0x1ed   : > { %1689 = vmatmul.mubr.bf16.gmra.mxu1 %v2397_v51 }
 0x1ee   : > { %1698 = vmatprep.mubr.bf16.mxu1 %v2398_v23  ;;  %v3432_v23 = vpop.permute.xlu1 %1373 }
 0x1ef   : > { %3954 = vst [vmem:[#allocation22_spill] sm:$0xff] %v3432_v23 }
 0x1f5   : > { %1699 = vmatmul.mubr.bf16.gmra.mxu1 %v2400_v33 }
 0x1f6   : > { %1708 = vmatprep.mubr.bf16.mxu1 %v2401_v53  ;;  %v3434_v53 = vpop.permute.xlu0 %1358 }
 0x1f7   : > { %3955 = vst [vmem:[#allocation15_spill] sm:$0xff] %v3434_v53 }
 0x1fd   : > { %1709 = vmatmul.mubr.bf16.gmra.mxu1 %v2403_v2 }
 0x1fe   : > { %1718 = vmatprep.mubr.bf16.mxu1 %v2404_v59 }
 0x205   : > { %1719 = vmatmul.mubr.bf16.gmra.mxu1 %v2406_v10  ;;  %v3436_v10 = vpop.permute.xlu1 %1363 }
 0x206   : > { %3956 = vst [vmem:[#allocation23_spill] sm:$0xff] %v3436_v10 }
 0x24d   : > { %v1570_v11 = vpop.f32.mrf.mxu1 }
 0x24e   : > { %v1571_v12 = vadd.f32 %v1570_v11, %v1219_v39 }
 0x24f   : > { %v1572_v31 = vpop.f32.mrf.mxu1 }
 0x250   : > { %v1573_v62 = vadd.f32 %v1572_v31, %v1219_v39  ;;  %v1793_v45 = vmul.f32 0.01, %v1571_v12  ;;  %vm1729_vm7 = vcmp.gt.f32.partialorder %v1571_v12, 0.0  ;;  %v3443_v31 = vpop.permute.xlu1 %1353 }
 0x251   : > { %v1574_v22 = vpop.f32.mrf.mxu1  ;;  %3958 = vst [vmem:[#allocation21_spill] sm:$0xff] %v3443_v31 }
 0x252   : > { %v1575_v7 = vadd.f32 %v1574_v22, %v1224_v43  ;;  %v1794_v27 = vmul.f32 0.01, %v1573_v62  ;;  %v3406_v61 = vsel %vm1729_vm7, %v1571_v12, %v1793_v45  ;;  %vm1730_vm13 = vcmp.gt.f32.partialorder %v1573_v62, 0.0  ;;  %v2409_v12 = vld [vmem:[%s3871_s6 + $0x4] ss:$8 sps:$4 sm:$0xff]  }
 0x253   : > { %v1576_v8 = vpop.f32.mrf.mxu1  ;;  %3950 = vst [vmem:[#allocation11_spill] sm:$0xff] %v3406_v61  ;;  %2009 = vmatprep.mubr.bf16.mxu0 %v2409_v12 }
 0x254   : > { %vm1731_vm10 = vcmp.gt.f32.partialorder %v1575_v7, 0.0  ;;  %v1795_v24 = vmul.f32 0.01, %v1575_v7  ;;  %v1577_v13 = vadd.f32 %v1576_v8, %v1224_v43  ;;  %v3412_v30 = vsel %vm1730_vm13, %v1573_v62, %v1794_v27 }
 0x255   : > { %v1580_v9 = vpop.f32.mrf.mxu1  ;;  %3952 = vst [vmem:[#allocation9_spill] sm:$0xff] %v3412_v30 }
 0x256   : > { %v3408_v21 = vsel %vm1731_vm10, %v1575_v7, %v1795_v24  ;;  %vm1732_vm15 = vcmp.gt.f32.partialorder %v1577_v13, 0.0  ;;  %v1796_v0 = vmul.f32 0.01, %v1577_v13  ;;  %v1581_v32 = vadd.f32 %v1580_v9, %v1229_v16  ;;  %v3447_v7 = vpop.permute.xlu1 %1343 }
 0x257   : > { %3951 = vst [vmem:[#allocation10_spill] sm:$0xff] %v3408_v21  ;;  %v1582_v56 = vpop.f32.mrf.mxu1  ;;  %3960 = vst [vmem:[#allocation18_spill] sm:$0xff] %v3447_v7 }
 0x258   : > { %v1583_v29 = vadd.f32 %v1582_v56, %v1229_v16  ;;  %v3414_v52 = vsel %vm1732_vm15, %v1577_v13, %v1796_v0  ;;  %v1797_v55 = vmul.f32 0.01, %v1581_v32  ;;  %vm1733_vm3 = vcmp.gt.f32.partialorder %v1581_v32, 0.0 }
 0x259   : > { %v1584_v14 = vpop.f32.mrf.mxu1 }
 0x25a   : > { %v1585_v28 = vadd.f32 %v1584_v14, %v1234_v60  ;;  %v1798_v17 = vmul.f32 0.01, %v1583_v29  ;;  %vm1734_vm2 = vcmp.gt.f32.partialorder %v1583_v29, 0.0  ;;  %v3418_v25 = vsel %vm1733_vm3, %v1581_v32, %v1797_v55  ;;  %v3451_v9 = vpop.permute.xlu1 %1333 }
 0x25b   : > { %v1586_v15 = vpop.f32.mrf.mxu1  ;;  %3962 = vst [vmem:[#allocation16_spill] sm:$0xff] %v3451_v9 }
 0x25c   : > { %vm1735_vm9 = vcmp.gt.f32.partialorder %v1585_v28, 0.0  ;;  %v1799_v20 = vmul.f32 0.01, %v1585_v28  ;;  %v1587_v18 = vadd.f32 %v1586_v15, %v1234_v60  ;;  %v3424_v19 = vsel %vm1734_vm2, %v1583_v29, %v1798_v17  ;;  %v3438_v60 = vpop.permute.xlu0 %1348 }
 0x25d   : > { %v1590_v47 = vpop.f32.mrf.mxu1  ;;  %3957 = vst [vmem:[#allocation20_spill] sm:$0xff] %v3438_v60 }
 0x25e   : > { %v3420_v1 = vsel %vm1735_vm9, %v1585_v28, %v1799_v20  ;;  %vm1736_vm8 = vcmp.gt.f32.partialorder %v1587_v18, 0.0  ;;  %v1800_v41 = vmul.f32 0.01, %v1587_v18  ;;  %v3465_v28 = vadd.f32 %v1590_v47, %v3402_v35 }
 0x25f   : > { %v1592_v57 = vpop.f32.mrf.mxu1 }
 0x260   : > { %v3426_v58 = vsel %vm1736_vm8, %v1587_v18, %v1800_v41  ;;  %v3445_v43 = vpop.permute.xlu0 %1338  ;;  %v3454_v32 = vadd.f32 %v1592_v57, %v3402_v35  ;;  %v3485_v35 = vpop.permute.xlu1 %1323 }
 0x261   : > { %v1594_v36 = vpop.f32.mrf.mxu1  ;;  %3959 = vst [vmem:[#allocation12_spill] sm:$0xff] %v3445_v43  ;;  %3964 = vst [vmem:[#allocation13_spill] sm:$0xff] %v3485_v35 }
 0x262   : > { %v3474_v18 = vmul.f32 0.01, %v3454_v32  ;;  %v3477_v41 = vadd.f32 %v1594_v36, %v3404_v54 }
 0x263   : > { %v1596_v44 = vpop.f32.mrf.mxu1 }
 0x264   : > { %v3449_v27 = vpop.permute.xlu0 %1328  ;;  %v3459_v29 = vadd.f32 %v1596_v44, %v3404_v54 }
 0x265   : > { %v1600_v51 = vpop.f32.mrf.mxu1  ;;  %3961 = vst [vmem:[#allocation19_spill] sm:$0xff] %v3449_v27 }
 0x266   : > { %v3488_v47 = vmul.f32 0.01, %v3459_v29 }
 0x267   : > { %v1602_v33 = vpop.f32.mrf.mxu1 }
 0x268   : > { %v3456_v56 = vpop.permute.xlu0 %1318  ;;  %v3462_v55 = vadd.f32 %v1602_v33, %v3398_v49  ;;  %v3491_v33 = vadd.f32 %v1600_v51, %v3398_v49 }
 0x269   : > { %v1604_v2 = vpop.f32.mrf.mxu1  ;;  %3963 = vst [vmem:[#allocation14_spill] sm:$0xff] %v3456_v56 }
 0x26b   : > { %v1606_v59 = vpop.f32.mrf.mxu1 }
 0x26c   : > { %v3468_v15 = vadd.f32 %v1606_v59, %v3400_v26  ;;  %v3511_v49 = vpop.permute.xlu0 %1308 }
 0x26d   : > { %v1610_v16 = vpop.f32.mrf.mxu1 }
 0x26e   : > { %v3471_v17 = vadd.f32 %v1610_v16, %v3394_v4  ;;  %v3503_v16 = vadd.f32 %v1604_v2, %v3400_v26 }
 0x26f   : > { %v1612_v39 = vpop.f32.mrf.mxu1 }
 0x270   : > { %v3480_v57 = vadd.f32 %v1612_v39, %v3394_v4  ;;  %v3500_v4 = vmul.f32 0.01, %v3462_v55  ;;  %v3517_v51 = vmul.f32 0.01, %v3471_v17  ;;  %v1299_v53 = vpop.permute.xlu0 %1298  ;;  %vm1745_vm8 = vcmp.gt.f32.partialorder %v3471_v17, 0.0 }
 0x271   : > { %v1614_v11 = vpop.f32.mrf.mxu1 }
 0x272   : > { %v3483_v44 = vadd.f32 %v1614_v11, %v3396_v5  ;;  %v3522_v2 = vmul.f32 0.01, %v3480_v57  ;;  %vm1746_vm7 = vcmp.gt.f32.partialorder %v3480_v57, 0.0 }
 0x273   : > { %v1616_v62 = vpop.f32.mrf.mxu1 }
 0x274   : > { %v3494_v59 = vadd.f32 %v1616_v62, %v3396_v5  ;;  %v3514_v5 = vmul.f32 0.01, %v3468_v15 }
 0x275   : > { %v1620_v45 = vpop.f32.mrf.mxu1 }
 0x276   : > { %v3497_v54 = vadd.f32 %v1620_v45, %v3390_v3  ;;  %vm1748_vm11 = vcmp.gt.f32.partialorder %v3494_v59, 0.0 }
 0x277   : > { %v1622_v22 = vpop.f32.mrf.mxu1 }
 0x278   : > { %v3506_v39 = vadd.f32 %v1622_v22, %v3390_v3  ;;  %v3525_v3 = vmul.f32 0.01, %v3483_v44  ;;  %v3535_v48 = vmul.f32 0.01, %v3497_v54  ;;  %vm1749_vm10 = vcmp.gt.f32.partialorder %v3497_v54, 0.0 }
 0x279   : > { %v1624_v8 = vpop.f32.mrf.mxu1 }
 0x27a   : > { %v3528_v45 = vadd.f32 %v1624_v8, %v3392_v38  ;;  %vm1750_vm14 = vcmp.gt.f32.partialorder %v3506_v39, 0.0  ;;  %v3541_v50 = vmul.f32 0.01, %v3506_v39 }
 0x27b   : > { %v1626_v24 = vpop.f32.mrf.mxu1 }
 0x27c   : > { %v3509_v11 = vadd.f32 %v1626_v24, %v3392_v38  ;;  %v3532_v24 = vmul.f32 0.01, %v3494_v59  ;;  %vm1751_vm1 = vcmp.gt.f32.partialorder %v3528_v45, 0.0 }
 0x27d   : > { %v1630_v13 = vpop.f32.mrf.mxu1 }
 0x27e   : > { %vm1752_vm12 = vcmp.gt.f32.partialorder %v3509_v11, 0.0  ;;  %v1816_v38 = vmul.f32 0.01, %v3509_v11  ;;  %v1631_v40 = vadd.f32 %v1630_v13, %v3386_v63 }
 0x27f   : > { %v1632_v0 = vpop.f32.mrf.mxu1 }
 0x280   : > { %v1633_v12 = vadd.f32 %v1632_v0, %v3386_v63  ;;  %vm1753_vm3 = vcmp.gt.f32.partialorder %v1631_v40, 0.0  ;;  %v1817_v43 = vmul.f32 0.01, %v1631_v40 }
 0x281   : > { %v1634_v14 = vpop.f32.mrf.mxu1 }
 0x282   : > { %v1635_v0 = vadd.f32 %v1634_v14, %v3388_v37  ;;  %vm1754_vm0 = vcmp.gt.f32.partialorder %v1633_v12, 0.0 }
 0x283   : > { %v1636_v20 = vpop.f32.mrf.mxu1 }
 0x284   : > { %v1637_v62 = vadd.f32 %v1636_v20, %v3388_v37  ;;  %v1818_v37 = vmul.f32 0.01, %v1633_v12  ;;  %v1819_v60 = vmul.f32 0.01, %v1635_v0  ;;  %vm1755_vm9 = vcmp.gt.f32.partialorder %v1635_v0, 0.0 }
 0x285   : > { %v1640_v36 = vpop.f32.mrf.mxu1 }
 0x286   : > { %v1641_v20 = vadd.f32 %v1640_v36, %v3382_v6  ;;  %v1820_v14 = vmul.f32 0.01, %v1637_v62  ;;  %vm1756_vm5 = vcmp.gt.f32.partialorder %v1637_v62, 0.0  ;;  %v1882_v30 = vsel %vm1754_vm0, %v1633_v12, %v1818_v37 }
 0x287   : > { %v1642_v26 = vpop.f32.mrf.mxu1  ;;  %vm1743_vm0 = vcmp.gt.f32.partialorder %v3503_v16, 0.0 }
 0x288   : > { %v1643_v22 = vadd.f32 %v1642_v26, %v3382_v6  ;;  %v3546_v26 = vpop.permute.xlu1 %1313  ;;  %vm1757_vm13 = vcmp.gt.f32.partialorder %v1641_v20, 0.0  ;;  %v1884_v35 = vsel %vm1756_vm5, %v1637_v62, %v1820_v14 }
 0x289   : > { %v1644_v42 = vpop.f32.mrf.mxu1  ;;  %v1934_v14 = vpack.c.bf16 %v1884_v35, %v1882_v30  ;;  %v1878_v30 = vsel %vm1750_vm14, %v3506_v39, %v3541_v50 }
 0x28a   : > { %v1645_v8 = vadd.f32 %v1644_v42, %v3384_v46  ;;  %v1822_v36 = vmul.f32 0.01, %v1643_v22  ;;  %v1821_v42 = vmul.f32 0.01, %v1641_v20  ;;  %vm1758_vm6 = vcmp.gt.f32.partialorder %v1643_v22, 0.0 }
 0x28b   : > { %v1646_v6 = vpop.f32.mrf.mxu1 }
 0x28c   : > { %vm1759_vm4 = vcmp.gt.f32.partialorder %v1645_v8, 0.0  ;;  %v1823_v31 = vmul.f32 0.01, %v1645_v8  ;;  %v1647_v23 = vadd.f32 %v1646_v6, %v3384_v46  ;;  %v1886_v9 = vsel %vm1758_vm6, %v1643_v22, %v1822_v36  ;;  %v1304_v10 = vpop.permute.xlu1 %1303 }
 0x28d   : > { %v1650_v7 = vpop.f32.mrf.mxu1  ;;  %v1885_v56 = vsel %vm1757_vm13, %v1641_v20, %v1821_v42  ;;  %v1815_v22 = vmul.f32 0.01, %v3528_v45  ;;  %vm1740_vm6 = vcmp.gt.f32.partialorder %v3459_v29, 0.0  ;;  %v1876_v20 = vsel %vm1748_vm11, %v3494_v59, %v3532_v24 }
 0x28e   : > { %vm1760_vm15 = vcmp.gt.f32.partialorder %v1647_v23, 0.0  ;;  %v1824_v63 = vmul.f32 0.01, %v1647_v23  ;;  %v1651_v13 = vadd.f32 %v1650_v7, %v1299_v53  ;;  %v1887_v46 = vsel %vm1759_vm4, %v1645_v8, %v1823_v31 }
 0x28f   : > { %v1652_v6 = vpop.f32.mrf.mxu1  ;;  %vm1742_vm4 = vcmp.gt.f32.partialorder %v3462_v55, 0.0  ;;  %v1883_v31 = vsel %vm1755_vm9, %v1635_v0, %v1819_v60  ;;  %v1935_v8 = vpack.c.bf16 %v1887_v46, %v1885_v56  ;;  %vm1747_vm9 = vcmp.gt.f32.partialorder %v3483_v44, 0.0 }
 0x290   : > { %v1653_v34 = vadd.f32 %v1652_v6, %v1299_v53  ;;  %v1888_v27 = vsel %vm1760_vm15, %v1647_v23, %v1824_v63  ;;  %v1825_v7 = vmul.f32 0.01, %v1651_v13  ;;  %vm1761_vm2 = vcmp.gt.f32.partialorder %v1651_v13, 0.0 }
 0x291   : > { %v1654_v61 = vpop.f32.mrf.mxu1  ;;  %v1936_v21 = vpack.c.bf16 %v1888_v27, %v1886_v9  ;;  %v1881_v23 = vsel %vm1753_vm3, %v1631_v40, %v1817_v43  ;;  %v1880_v27 = vsel %vm1752_vm12, %v3509_v11, %v1816_v38  ;;  %vm1741_vm12 = vcmp.gt.f32.partialorder %v3491_v33, 0.0 }
 0x292   : > { %v1655_v53 = vadd.f32 %v1654_v61, %v1304_v10  ;;  %v1826_v9 = vmul.f32 0.01, %v1653_v34  ;;  %v1933_v61 = vpack.c.bf16 %v1883_v31, %v1881_v23  ;;  %v3571_v56 = vsel %vm1761_vm2, %v1651_v13, %v1825_v7 }
 0x293   : > { %v1656_v62 = vpop.f32.mrf.mxu1  ;;  %1977 = vmatprep.subr.bf16.mxu0 %v1936_v21  ;;  %vm1762_vm13 = vcmp.gt.f32.partialorder %v1653_v34, 0.0  ;;  %vm1738_vm3 = vcmp.gt.f32.partialorder %v3454_v32, 0.0  ;;  %v1879_v35 = vsel %vm1751_vm1, %v3528_v45, %v1815_v22  ;;  %v1932_v39 = vpack.c.bf16 %v1880_v27, %v1878_v30 }
 0x294   : > { %vm1763_vm5 = vcmp.gt.f32.partialorder %v1655_v53, 0.0  ;;  %v1827_v12 = vmul.f32 0.01, %v1655_v53  ;;  %v1657_v60 = vadd.f32 %v1656_v62, %v1304_v10  ;;  %1978 = vmatpush1.bf16.msra.mxu0 %v1935_v8  ;;  %v3594_v38 = vsel %vm1762_vm13, %v1653_v34, %v1826_v9 }
 0x295   : > { %v1660_v21 = vpop.f32.mrf.mxu1  ;;  %1979 = vmatprep.subr.bf16.mxu0 %v1934_v14  ;;  %v1807_v45 = vmul.f32 0.01, %v3503_v16  ;;  %v1877_v36 = vsel %vm1749_vm10, %v3497_v54, %v3535_v48  ;;  %v1875_v59 = vsel %vm1747_vm9, %v3483_v44, %v3525_v3  ;;  %v1873_v48 = vsel %vm1745_vm8, %v3471_v17, %v3517_v51 }
 0x296   : > { %v3578_v40 = vsel %vm1763_vm5, %v1655_v53, %v1827_v12  ;;  %vm1764_vm15 = vcmp.gt.f32.partialorder %v1657_v60, 0.0  ;;  %v1828_v10 = vmul.f32 0.01, %v1657_v60  ;;  %v1661_v43 = vadd.f32 %v1660_v21, %v3511_v49 }
 0x297   : > { %v1937_v11 = vpack.c.bf16 %v3578_v40, %v3571_v56  ;;  %v1662_v50 = vpop.f32.mrf.mxu1  ;;  %v1931_v24 = vpack.c.bf16 %v1879_v35, %v1877_v36  ;;  %vm3965_vm1 = vcmp.gt.f32.partialorder %v3468_v15, 0.0  ;;  %v1805_v6 = vmul.f32 0.01, %v3491_v33 }
 0x298   : > { %v1663_v0 = vadd.f32 %v1662_v50, %v3511_v49  ;;  %1980 = vmatpush1.bf16.msra.mxu0 %v1933_v61  ;;  %v3596_v37 = vsel %vm1764_vm15, %v1657_v60, %v1828_v10  ;;  %v1874_v49 = vsel %vm1746_vm7, %v3480_v57, %v3522_v2  ;;  %v1829_v63 = vmul.f32 0.01, %v1661_v43 }
 0x299   : > { %v1664_v42 = vpop.f32.mrf.mxu1  ;;  %1981 = vmatprep.subr.bf16.mxu0 %v1932_v39  ;;  %v1938_v34 = vpack.c.bf16 %v3596_v37, %v3594_v38  ;;  %vm1765_vm14 = vcmp.gt.f32.partialorder %v1661_v43, 0.0  ;;  %v1930_v57 = vpack.c.bf16 %v1876_v20, %v1874_v49  ;;  %v1872_v2 = vsel %vm3965_vm1, %v3468_v15, %v3514_v5  ;;  %v3971_v20 = vld [vmem:[#allocation11_spill] sm:$0xff] }
 0x29a   : > { %v1665_v13 = vadd.f32 %v1664_v42, %v3546_v26  ;;  %v1830_v46 = vmul.f32 0.01, %v1663_v0  ;;  %v1929_v7 = vpack.c.bf16 %v1875_v59, %v1873_v48  ;;  %vm1766_vm7 = vcmp.gt.f32.partialorder %v1663_v0, 0.0  ;;  %v3973_v48 = vld [vmem:[#allocation14_spill] sm:$0xff] }
 0x29b   : > { %v1666_v54 = vpop.f32.mrf.mxu1  ;;  %v1870_v17 = vsel %vm1742_vm4, %v3462_v55, %v3500_v4  ;;  %v3630_v51 = vsel %vm1765_vm14, %v1661_v43, %v1829_v63  ;;  %v1871_v8 = vsel %vm1743_vm0, %v3503_v16, %v1807_v45  ;;  %vm1739_vm2 = vcmp.gt.f32.partialorder %v3477_v41, 0.0 }
 0x29c   : > { %vm1767_vm11 = vcmp.gt.f32.partialorder %v1665_v13, 0.0  ;;  %v1831_v44 = vmul.f32 0.01, %v1665_v13  ;;  %v1667_v3 = vadd.f32 %v1666_v54, %v3546_v26  ;;  %1982 = vmatpush1.bf16.msra.mxu0 %v1931_v24  ;;  %v1803_v26 = vmul.f32 0.01, %v3477_v41 }
 0x29d   : > { %v3624_v31 = vpop.f32.mrf.mxu1  ;;  %1983 = vmatprep.subr.bf16.mxu0 %v1930_v57  ;;  %v1928_v23 = vpack.c.bf16 %v1872_v2, %v1870_v17  ;;  %v1868_v55 = vsel %vm1740_vm6, %v3459_v29, %v3488_v47  ;;  %v3646_v4 = vsel %vm1766_vm7, %v1663_v0, %v1830_v46  ;;  %v1801_v16 = vmul.f32 0.01, %v3465_v28  ;;  %v3970_v0 = vld [vmem:[#allocation10_spill] sm:$0xff]  ;;  %v3975_v46 = vld [vmem:[#allocation13_spill] sm:$0xff] }
 0x29e   : > { %v3632_v15 = vsel %vm1767_vm11, %v1665_v13, %v1831_v44  ;;  %vm1768_vm10 = vcmp.gt.f32.partialorder %v1667_v3, 0.0  ;;  %v1832_v5 = vmul.f32 0.01, %v1667_v3  ;;  %v1869_v14 = vsel %vm1741_vm12, %v3491_v33, %v1805_v6 }
 0x29f   : > { %v1939_v53 = vpack.c.bf16 %v3632_v15, %v3630_v51  ;;  %v1672_v22 = vpop.f32.mrf.mxu1  ;;  %vm1737_vm8 = vcmp.gt.f32.partialorder %v3465_v28, 0.0  ;;  %v1927_v12 = vpack.c.bf16 %v1871_v8, %v1869_v14  ;;  %v1866_v29 = vsel %vm1738_vm3, %v3454_v32, %v3474_v18  ;;  %v3979_v8 = vld [vmem:[#allocation12_spill] sm:$0xff] }
 0x2a0   : > { %1984 = vmatpush1.bf16.msra.mxu0 %v1929_v7  ;;  %v3648_v62 = vsel %vm1768_vm10, %v1667_v3, %v1832_v5  ;;  %v1867_v47 = vsel %vm1739_vm2, %v3477_v41, %v1803_v26  ;;  %v1926_v61 = vpack.c.bf16 %v1868_v55, %v1866_v29  ;;  %v1865_v33 = vsel %vm1737_vm8, %v3465_v28, %v1801_v16  ;;  %v3968_v28 = vld [vmem:[#allocation9_spill] sm:$0xff]  ;;  %v3976_v3 = vld [vmem:[#allocation19_spill] sm:$0xff]  ;;  %v3977_v7 = vld [vmem:[#allocation16_spill] sm:$0xff] }
 0x2a1   : > { %v1674_v27 = vpop.f32.mrf.mxu1  ;;  %1985 = vmatprep.subr.bf16.mxu0 %v1928_v23  ;;  %v1940_v9 = vpack.c.bf16 %v3648_v62, %v3646_v4  ;;  %v1925_v30 = vpack.c.bf16 %v1867_v47, %v1865_v33  ;;  %v3966_v35 = vpack.c.bf16 %v3426_v58, %v3424_v19  ;;  %v3967_v18 = vpack.c.bf16 %v3420_v1, %v3418_v25  ;;  %v3978_v5 = vld [vmem:[#allocation8_spill] sm:$0xff]  ;;  %v3980_v55 = vld [vmem:[#allocation18_spill] sm:$0xff] }
 0x2a2   : > { %v3969_v50 = vpack.c.bf16 %v3414_v52, %v3968_v28  ;;  %v3972_v45 = vpack.c.bf16 %v3970_v0, %v3971_v20  ;;  %v3684_v54 = vadd.f32 %v1672_v22, %v3973_v48  ;;  %v3974_v52 = vld [vmem:[#allocation23_spill] sm:$0xff]  ;;  %v3688_v44 = vadd.f32 %v1674_v27, %v3975_v46 }
 0x2a3   : > { %v3662_v60 = vpop.f32.mrf.mxu1  ;;  %v2050_v40 = vlaneseq }
 0x2a4   : > { %1986 = vmatpush1.bf16.msra.mxu0 %v1927_v12  ;;  %v3981_v12 = vld [vmem:[#allocation20_spill] sm:$0xff] }
 0x2a5   : > { %v3665_v21 = vpop.f32.mrf.mxu1  ;;  %1987 = vmatprep.subr.bf16.mxu0 %v1926_v61  ;;  %v3982_v61 = vld [vmem:[#allocation15_spill] sm:$0xff] }
 0x2a7   : > { %v1682_v10 = vpop.f32.mrf.mxu1 }
 0x2a8   : > { %1988 = vmatpush1.bf16.msra.mxu0 %v1925_v30  ;;  %v3691_v6 = vadd.f32 %v1682_v10, %v3976_v3  ;;  %v3983_v30 = vld [vmem:[#allocation22_spill] sm:$0xff] }
 0x2a9   : > { %v1684_v43 = vpop.f32.mrf.mxu1  ;;  %1989 = vmatprep.subr.bf16.mxu0 %v3966_v35 }
 0x2aa   : > { %v3694_v17 = vadd.f32 %v1684_v43, %v3977_v7  ;;  %v3984_v43 = vld [vmem:[#allocation21_spill] sm:$0xff] }
 0x2ab   : > { %v3670_v32 = vpop.f32.mrf.mxu1 }
 0x2ac   : > { %1990 = vmatpush1.bf16.msra.mxu0 %v3967_v18 }
 0x2ad   : > { %v3675_v41 = vpop.f32.mrf.mxu1  ;;  %1991 = vmatprep.subr.bf16.mxu0 %v3969_v50 }
 0x2af   : > { %v1692_v39 = vpop.f32.mrf.mxu1 }
 0x2b0   : > { %1992 = vmatpush1.bf16.msra.mxu0 %v3972_v45  ;;  %v3698_v23 = vadd.f32 %v1692_v39, %v3979_v8 }
 0x2b1   : > { %v1694_v36 = vpop.f32.mrf.mxu1 }
 0x2b2   : > { %v3701_v22 = vadd.f32 %v1694_v36, %v3980_v55  ;;  %vm1778_vm10 = vcmp.gt.f32.partialorder %v3698_v23, 0.0 }
 0x2b3   : > { %v1696_v19 = vpop.f32.mrf.mxu1 }
 0x2b4   : > { %v3704_v16 = vadd.f32 %v1696_v19, %v3980_v55  ;;  %vm1779_vm2 = vcmp.gt.f32.partialorder %v3701_v22, 0.0 }
 0x2b5   : > { %v1700_v58 = vpop.f32.mrf.mxu1 }
 0x2b6   : > { %v3708_v29 = vadd.f32 %v1700_v58, %v3981_v12  ;;  %vm1780_vm11 = vcmp.gt.f32.partialorder %v3704_v16, 0.0 }
 0x2b7   : > { %v1702_v42 = vpop.f32.mrf.mxu1 }
 0x2b8   : > { %v1703_v47 = vadd.f32 %v1702_v42, %v3981_v12  ;;  %vm1781_vm7 = vcmp.gt.f32.partialorder %v3708_v29, 0.0 }
 0x2b9   : > { %v1704_v49 = vpop.f32.mrf.mxu1 }
 0x2ba   : > { %v1705_v35 = vadd.f32 %v1704_v49, %v3984_v43  ;;  %vm1782_vm14 = vcmp.gt.f32.partialorder %v1703_v47, 0.0 }
 0x2bb   : > { %v1706_v59 = vpop.f32.mrf.mxu1 }
 0x2bc   : > { %v1707_v18 = vadd.f32 %v1706_v59, %v3984_v43  ;;  %v1847_v12 = vmul.f32 0.01, %v1705_v35  ;;  %vm1783_vm1 = vcmp.gt.f32.partialorder %v1705_v35, 0.0 }
 0x2bd   : > { %v1710_v24 = vpop.f32.mrf.mxu1 }
 0x2be   : > { %v1711_v36 = vadd.f32 %v1710_v24, %v3982_v61  ;;  %v1848_v49 = vmul.f32 0.01, %v1707_v18  ;;  %vm1784_vm3 = vcmp.gt.f32.partialorder %v1707_v18, 0.0  ;;  %v1846_v24 = vmul.f32 0.01, %v1703_v47 }
 0x2bf   : > { %v1712_v25 = vpop.f32.mrf.mxu1 }
 0x2c0   : > { %v1713_v33 = vadd.f32 %v1712_v25, %v3982_v61  ;;  %vm1785_vm9 = vcmp.gt.f32.partialorder %v1711_v36, 0.0 }
 0x2c1   : > { %v1714_v1 = vpop.f32.mrf.mxu1 }
 0x2c2   : > { %v1715_v28 = vadd.f32 %v1714_v1, %v3974_v52  ;;  %v1850_v58 = vmul.f32 0.01, %v1713_v33  ;;  %vm1786_vm12 = vcmp.gt.f32.partialorder %v1713_v33, 0.0 }
 0x2c3   : > { %v1716_v63 = vpop.f32.mrf.mxu1 }
 0x2c4   : > { %v1717_v57 = vadd.f32 %v1716_v63, %v3974_v52  ;;  %v1851_v59 = vmul.f32 0.01, %v1715_v28  ;;  %vm1787_vm15 = vcmp.gt.f32.partialorder %v1715_v28, 0.0  ;;  %v1849_v52 = vmul.f32 0.01, %v1711_v36 }
 0x2c5   : > { %v1720_v13 = vpop.f32.mrf.mxu1 }
 0x2c6   : > { %v1721_v14 = vadd.f32 %v1720_v13, %v3978_v5  ;;  %v1852_v50 = vmul.f32 0.01, %v1717_v57  ;;  %vm1788_vm0 = vcmp.gt.f32.partialorder %v1717_v57, 0.0  ;;  %v1915_v61 = vsel %vm1787_vm15, %v1715_v28, %v1851_v59 }
 0x2c7   : > { %v1722_v2 = vpop.f32.mrf.mxu1  ;;  %v1913_v43 = vsel %vm1785_vm9, %v1711_v36, %v1849_v52  ;;  %v1842_v28 = vmul.f32 0.01, %v3698_v23  ;;  %v1835_v59 = vmul.f32 0.01, %v3688_v44  ;;  %vm1771_vm15 = vcmp.gt.f32.partialorder %v3688_v44, 0.0 }
 0x2c8   : > { %v1723_v26 = vadd.f32 %v1722_v2, %v3978_v5  ;;  %v1853_v19 = vmul.f32 0.01, %v1721_v14  ;;  %vm1789_vm6 = vcmp.gt.f32.partialorder %v1721_v14, 0.0  ;;  %v1916_v13 = vsel %vm1788_vm0, %v1717_v57, %v1852_v50 }
 0x2c9   : > { %v1724_v27 = vpop.f32.mrf.mxu1  ;;  %v1912_v57 = vsel %vm1784_vm3, %v1707_v18, %v1848_v49  ;;  %v1843_v18 = vmul.f32 0.01, %v3701_v22  ;;  %v1911_v50 = vsel %vm1783_vm1, %v1705_v35, %v1847_v12  ;;  %v1838_v35 = vmul.f32 0.01, %v3691_v6 }
 0x2ca   : > { %v1725_v10 = vadd.f32 %v1724_v27, %v3983_v30  ;;  %v1854_v0 = vmul.f32 0.01, %v1723_v26  ;;  %vm1790_vm5 = vcmp.gt.f32.partialorder %v1723_v26, 0.0  ;;  %v1917_v2 = vsel %vm1789_vm6, %v1721_v14, %v1853_v19 }
 0x2cb   : > { %v1726_v39 = vpop.f32.mrf.mxu1  ;;  %v1914_v27 = vsel %vm1786_vm12, %v1713_v33, %v1850_v58  ;;  %v1691_v14 = vadd.f32 %v3675_v41, %v3979_v8  ;;  %v1845_v33 = vmul.f32 0.01, %v3708_v29  ;;  %v1677_v8 = vadd.f32 %v3662_v60, %v3975_v46 }
 0x2cc   : > { %vm1791_vm4 = vcmp.gt.f32.partialorder %v1725_v10, 0.0  ;;  %v1855_v20 = vmul.f32 0.01, %v1725_v10  ;;  %v1727_v45 = vadd.f32 %v1726_v39, %v3983_v30  ;;  %v1918_v1 = vsel %vm1790_vm5, %v1723_v26, %v1854_v0 }
 0x2cd   : > { %v1950_v30 = vpack.c.bf16 %v1916_v13, %v1914_v27  ;;  %v1844_v26 = vmul.f32 0.01, %v3704_v16  ;;  %v1906_v46 = vsel %vm1778_vm10, %v3698_v23, %v1842_v28  ;;  %vm1774_vm0 = vcmp.gt.f32.partialorder %v3691_v6, 0.0 }
 0x2ce   : > { %vm1792_vm13 = vcmp.gt.f32.partialorder %v1727_v45, 0.0  ;;  %v1856_v42 = vmul.f32 0.01, %v1727_v45  ;;  %v1919_v25 = vsel %vm1791_vm4, %v1725_v10, %v1855_v20  ;;  %v1687_v10 = vadd.f32 %v3670_v32, %v3977_v7 }
 0x2cf   : > { %v1951_v55 = vpack.c.bf16 %v1919_v25, %v1917_v2  ;;  %v1949_v32 = vpack.c.bf16 %v1915_v61, %v1913_v43  ;;  %v1910_v7 = vsel %vm1782_vm14, %v1703_v47, %v1846_v24  ;;  %v1908_v0 = vsel %vm1780_vm11, %v3704_v16, %v1844_v26 }
 0x2d0   : > { %v1920_v63 = vsel %vm1792_vm13, %v1727_v45, %v1856_v42  ;;  %v1948_v41 = vpack.c.bf16 %v1912_v57, %v1910_v7  ;;  %v1840_v39 = vmul.f32 0.01, %v1687_v10  ;;  %v1681_v47 = vadd.f32 %v3665_v21, %v3976_v3 }
 0x2d1   : > { %v1952_v5 = vpack.c.bf16 %v1920_v63, %v1918_v1  ;;  %vm1776_vm8 = vcmp.gt.f32.partialorder %v1687_v10, 0.0  ;;  %v1841_v20 = vmul.f32 0.01, %v1691_v14  ;;  %v1909_v45 = vsel %vm1781_vm7, %v3708_v29, %v1845_v33 }
 0x2d2   : > { %vm1777_vm4 = vcmp.gt.f32.partialorder %v1691_v14, 0.0  ;;  %v1947_v60 = vpack.c.bf16 %v1911_v50, %v1909_v45  ;;  %v1839_v16 = vmul.f32 0.01, %v3694_v17  ;;  %v1907_v36 = vsel %vm1779_vm2, %v3701_v22, %v1843_v18  ;;  %v1965_v50 = vpop.permute.xlu1 %1964 }
 0x2d3   : > { %1993 = vmatprep.subr.bf16.mxu0 %v1952_v5  ;;  %v1946_v21 = vpack.c.bf16 %v1908_v0, %v1906_v46  ;;  %v1836_v3 = vmul.f32 0.01, %v1677_v8  ;;  %vm1775_vm5 = vcmp.gt.f32.partialorder %v3694_v17, 0.0  ;;  %v1904_v29 = vsel %vm1776_vm8, %v1687_v10, %v1840_v39 }
 0x2d4   : > { %1994 = vmatpush2.bf16.msra.mxu0 %v1951_v55  ;;  %v1671_v19 = vadd.f32 %v3624_v31, %v3973_v48  ;;  %vm1772_vm6 = vcmp.gt.f32.partialorder %v1677_v8, 0.0  ;;  %v1837_v58 = vmul.f32 0.01, %v1681_v47  ;;  %v1905_v42 = vsel %vm1777_vm4, %v1691_v14, %v1841_v20 }
 0x2d5   : > { %1995 = vmatprep.subr.bf16.mxu0 %v1950_v30  ;;  %v1834_v23 = vmul.f32 0.01, %v3684_v54  ;;  %vm1773_vm13 = vcmp.gt.f32.partialorder %v1681_v47, 0.0  ;;  %v1945_v49 = vpack.c.bf16 %v1907_v36, %v1905_v42  ;;  %v1902_v22 = vsel %vm1774_vm0, %v3691_v6, %v1838_v35 }
 0x2d6   : > { %vm1770_vm12 = vcmp.gt.f32.partialorder %v3684_v54, 0.0  ;;  %v1903_v25 = vsel %vm1775_vm5, %v3694_v17, %v1839_v16  ;;  %v1944_v1 = vpack.c.bf16 %v1904_v29, %v1902_v22  ;;  %v1900_v31 = vsel %vm1772_vm6, %v1677_v8, %v1836_v3  ;;  %v2021_v8 = vld [vmem:[%s364_s17 + $0x8] sm:$0xff] }
 0x2d7   : > { %v1833_v48 = vmul.f32 0.01, %v1671_v19  ;;  %v1901_v63 = vsel %vm1773_vm13, %v1681_v47, %v1837_v58  ;;  %vm1769_vm3 = vcmp.gt.f32.partialorder %v1671_v19, 0.0  ;;  %v1898_v52 = vsel %vm1770_vm12, %v3684_v54, %v1834_v23  ;;  %v2407_v54 = vld [vmem:[%s3871_s6] ss:$8 sps:$4 sm:$0xff]  }
 0x2d8   : > { %1996 = vmatpush2.bf16.msra.mxu0 %v1949_v32  ;;  %v1943_v13 = vpack.c.bf16 %v1903_v25, %v1901_v63  ;;  %v1899_v6 = vsel %vm1771_vm15, %v3688_v44, %v1835_v59  ;;  %v1942_v2 = vpack.c.bf16 %v1900_v31, %v1898_v52  ;;  %v1960_v44 = vpop.permute.xlu0 %1959  ;;  %v2507_v17 = vmov 1966171168   ;;  %v2020_v32 = vld [vmem:[%s364_s17] sm:$0xff] }
 0x2d9   : > { %1997 = vmatprep.subr.bf16.mxu0 %v1948_v41  ;;  %v1897_v5 = vsel %vm1769_vm3, %v1671_v19, %v1833_v48  ;;  %v2048_v55 = vunpack.c.l.s4 %v2507_v17  ;;  %v2051_v26 = vshrl.u32 %v2050_v40, 7  ;;  %vm2064_vm9 = vcmp.lt.s32.totalorder %v2050_v40, 256 }
 0x2da   : > { %v1941_v24 = vpack.c.bf16 %v1899_v6, %v1897_v5 }
 0x2db   : > { %v2049_v10 = vunpack.c.0.s8 %v2048_v55 }
 0x2dc   : > { %1998 = vmatpush2.bf16.msra.mxu0 %v1947_v60 }
 0x2dd   : > { %1999 = vmatprep.subr.bf16.mxu0 %v1946_v21  ;;  %v2052_v28 = vsub.s32 %v2049_v10, %v2051_v26 }
 0x2e0   : > { %2000 = vmatpush2.bf16.msra.mxu0 %v1945_v49 }
 0x2e1   : > { %2001 = vmatprep.subr.bf16.mxu0 %v1944_v1 }
 0x2e4   : > { %2002 = vmatpush2.bf16.msra.mxu0 %v1943_v13 }
 0x2e5   : > { %2003 = vmatprep.subr.bf16.mxu0 %v1942_v2 }
 0x2e8   : > { %2004 = vmatpush2.bf16.msra.mxu0 %v1941_v24 }
 0x2e9   : > { %2005 = vmatprep.subr.bf16.mxu0 %v1940_v9 }
 0x2ec   : > { %2006 = vmatpush2.bf16.msra.mxu0 %v1939_v53 }
 0x2ed   : > { %2007 = vmatprep.subr.bf16.mxu0 %v1938_v34 }
 0x2f0   : > { %2008 = vmatpush2.bf16.msra.mxu0 %v1937_v11 }
 0x2f3   : > { %2010 = vmatmul.mubr.bf16.vlgmr.msra.gmra.mxu0 %v2407_v54 }
 0x3b3   : > { %v2011_v4 = vpop.f32.mrf.mxu0 }
 0x3b4   : > { %v2012_v62 = vadd.f32 %v2011_v4, %v1960_v44 }
 0x3b5   : > { %v2013_v9 = vpop.f32.mrf.mxu0 }
 0x3b6   : > { %v2022_v51 = vmul.f32 1.442695, %v2012_v62  ;;  %v2032_v15 = vrot.slane %v2012_v62, 4  ;;  %v2014_v53 = vadd.f32 %v2013_v9, %v1960_v44 }
 0x3b7   : > { %v2015_v14 = vpop.f32.mrf.mxu0 }
 0x3b8   : > { %2410 = vpow2.f32 %v2022_v51  ;;  %v2033_v38 = vadd.f32 %v2032_v15, %v2012_v62  ;;  %v2024_v37 = vmul.f32 1.442695, %v2014_v53  ;;  %v2038_v34 = vrot.slane %v2014_v53, 4 }
 0x3b9   : > { %v2017_v41 = vpop.f32.mrf.mxu0  ;;  %v2016_v39 = vadd.f32 %v2015_v14, %v1965_v50 }
 0x3ba   : > { %v2034_v27 = vrot.slane %v2033_v38, 2  ;;  %2412 = vpow2.f32 %v2024_v37  ;;  %v2039_v56 = vadd.f32 %v2038_v34, %v2014_v53  ;;  %v2018_v35 = vadd.f32 %v2017_v41, %v1965_v50 }
 0x3bc   : > { %v2035_v11 = vadd.f32 %v2034_v27, %v2033_v38  ;;  %v2040_v12 = vrot.slane %v2039_v56, 2 }
 0x3be   : > { %v2036_v61 = vrot.slane %v2035_v11, 1  ;;  %v2041_v30 = vadd.f32 %v2040_v12, %v2039_v56 }
 0x3c0   : > { %v2042_v57 = vrot.slane %v2041_v30, 1  ;;  %v2037_v33 = vadd.f32 %v2036_v61, %v2035_v11 }
 0x3c2   : > { %v2043_v43 = vadd.f32 %v2042_v57, %v2041_v30 }
 0x3c4   : > { %v2046_v7 = vcombine.low %v2037_v33, %v2043_v43 }
 0x3c5   : > { %v2411_v18 = vpop.eup %2410 }
 0x3c6   : > { %v2026_v0 = vmul.f32 %v2411_v18, %v2020_v32  ;;  %v2053_v47 = vrot.slane %v2046_v7, %v2052_v28 }
 0x3c7   : > { %v2413_v20 = vpop.eup %2412 }
 0x3c8   : > { %v2028_v45 = vadd.f32 %v2026_v0, %v2016_v39  ;;  %v2027_v60 = vmul.f32 %v2413_v20, %v2021_v8  ;;  %v2060_v46 = vrot.slane %v2053_v47, %v2052_v28 }
 0x3ca   : > { %2030 = vst [vmem:[%s3787_s26] sm:$0xff] %v2028_v45  ;;  %v2029_v16 = vadd.f32 %v2027_v60, %v2018_v35  ;;  %2066 = vst.msk [vmem:[%s353_s23] sm:$0x3] %vm2064_vm9, %v2060_v46 }
 0x3cb   : > { %2427 = shalt.err (!%p2424_p3)
}
 0x3cc   : > { %s2428_s23 = scalar_lea.hbm %s3793_s16, 32  ;;  %s2432_s17 = scalar_lea.hbm %s3874_s9, 64 }
 0x3cd   : > { %p2429_p4 = scmp.ne.s32.totalorder %s3793_s16, %s2428_s23  ;;  %p2433_p9 = scmp.lt.s32.totalorder %s3793_s16, %s3874_s9 }
 0x3ce   : > { %p2434_p10 = scmp.lt.s32.totalorder %s2432_s17, %s2428_s23 }
 0x3cf   : > { %p2430_p7 = pnand %p2429_p4, %p2598_p5 }
 0x3d0   : > { %p2435_p11 = por %p2434_p10, %p2433_p9 }
 0x3d1   : > { %p2431_p8 = pneg %p2430_p7 }
 0x3d3   : > { %p2436_p12 = pnand %p2435_p11, %p2431_p8 }
 0x3d5   : > { %2439 = shalt.err (!%p2436_p12)
}
 0x3d6   : > { %2294 = dma.vmem_to_hbm [thread:$0]  (%p2598_p5), %s3795_s25, 32, %s3793_s16, %s2073_s0   ;;  %2031 = vst [vmem:[%s3787_s26 + $0x8] sm:$0xff] %v2029_v16 }
 0x3d7   : > { %s2068_s1 = scalar_lea.sflag [#allocation3], %s3777_s27  ;;  %s2440_s14 = scalar_lea.vmem %s3803_s28, 256 }
 0x3d8   : > { %p2441_p13 = scmp.ne.s32.totalorder %s3803_s28, %s2440_s14  ;;  %s2509_s2 = smov [#allocation2]  }
 0x3d9   : > { %s2444_s29 = sshll.u32 %s2509_s2, 4  ;;  %s2445_s29 = int_to_ptr.vmem [resolvable:$false] %s2444_s29 }
 0x3da   : > { %p2442_p0 = pnand %p2441_p13, %p2598_p5  ;;  %s2446_s23 = scalar_lea.vmem %s2445_s29, 512 }
 0x3db   : > { %p2447_p2 = scmp.lt.s32.totalorder %s3803_s28, %s2445_s29  ;;  %p2448_p3 = scmp.lt.s32.totalorder %s2446_s23, %s2440_s14 }
 0x3dc   : > { %p2443_p1 = pneg %p2442_p0 }
 0x3dd   : > { %p2449_p4 = por %p2448_p3, %p2447_p2 }
 0x3df   : > { %p2450_p7 = pnand %p2449_p4, %p2443_p1 }
 0x3e1   : > { %2453 = shalt.err (!%p2450_p7)
}
 0x3e2   : > { %s2454_s0 = scalar_lea.hbm %s3801_s22, 256  ;;  %s2458_s26 = scalar_lea.hbm %s3873_s8, 512 }
 0x3e3   : > { %p2455_p8 = scmp.ne.s32.totalorder %s3801_s22, %s2454_s0  ;;  %p2459_p11 = scmp.lt.s32.totalorder %s3801_s22, %s3873_s8 }
 0x3e4   : > { %p2460_p12 = scmp.lt.s32.totalorder %s2458_s26, %s2454_s0 }
 0x3e5   : > { %p2456_p9 = pnand %p2455_p8, %p2598_p5 }
 0x3e6   : > { %p2461_p13 = por %p2460_p12, %p2459_p11 }
 0x3e7   : > { %p2457_p10 = pneg %p2456_p9 }
 0x3e9   : > { %p2462_p0 = pnand %p2461_p13, %p2457_p10 }
 0x3eb   : > { %2465 = shalt.err (!%p2462_p0)
}
 0x3ec   : > { %2293 = dma.vmem_to_hbm [thread:$0]  (%p2598_p5), %s3803_s28, 256, %s3801_s22, %s2068_s1  }
 0x3ed PF: > { %p2304_p1 = scmp.ge.s32.totalorder %s2504_s12, 2  ;;  %s2113_s13 = sand.u32 1, %s2492_s30  }
 0x3ee   : > { %s2114_s17 = scalar_lea.sflag [#allocation3], %s2113_s13 }
 0x3ef   : > { %p2298_p2 = pnand %p2304_p1, %p2602_p6 }
 0x3f1   : > { %p2299_p3 = pneg %p2298_p2 }
 0x3f3   : > { %2483 = dma.done.wait (%p2299_p3), %s2114_s17, 256  }
 0x3f4   : > { %2485 = vsyncadd (%p2299_p3), %s2114_s17, 4294967040  ;;  %s2123_s21 = scalar_lea.sflag [#allocation5], %s2113_s13 }
 0x3f5   : > { %2487 = dma.done.wait (%p2299_p3), %s2123_s21, 32  }
 0x3f6   : > { %2489 = vsyncadd (%p2299_p3), %s2123_s21, 4294967264  ;;  %p23_p5 = scmp.ge.s32.totalorder %s2585_s15, 4   ;;  %s3986_s30 = smov %s2496_s10 }
 0x3f7   : > { %s3987_s10 = smov %s2500_s11  ;;  %s3988_s11 = smov %s2596_s18 }
 0x3f8   : > { %s3989_s12 = smov %s2585_s15  ;;  %25 = sbr.rel (!%p23_p5) target bundleno = 9 (0x9), region = 107 }
 0x3fd   :  { %2128 = vsyncpa [#allocation3], 1 }
 0x3fe   :  { %2130 = vsyncpa [#allocation3 + $0x1], 1 }
 0x3ff   :  { %2131 = vsyncpa [#allocation5], 1 }
 0x400   :  { %2133 = vsyncpa [#allocation5 + $0x1], 1 }

</bundles_post_ra>
